<compile_context>
chip_gen: v5e
topology: v5e:2x2
jax: 0.10.0
libtpu: 0.0.40
codegen_flags: <defaults>
</compile_context>

<pallas_src>
import jax
import jax.numpy as jnp
from jax.experimental import pallas as pl
from jax.experimental.pallas import tpu as pltpu

EPS = 1e-5


def conv1x1_bn_kernel(w_ref, x_ref, gamma_ref, beta_ref, o_ref):
    # w_ref:     (Cout, tk)   weight tile
    # x_ref:     (tk,   M )   input tile (channels-major, zero-copy view of NCHW with N=1)
    # gamma/beta:(Cout, 1 )
    # o_ref:     (Cout, M )   resident accumulator / final output
    k = pl.program_id(0)

    @pl.when(k == 0)
    def _init():
        o_ref[...] = jnp.zeros_like(o_ref)

    # 1x1 conv == matmul on the MXU; accumulate over the Cin (K) grid axis.
    o_ref[...] += jnp.dot(w_ref[...], x_ref[...],
                          preferred_element_type=jnp.float32)

    @pl.when(k == pl.num_programs(0) - 1)
    def _finalize():
        y = o_ref[...]                                   # (Cout, M) f32
        inv_m = jnp.float32(1.0 / y.shape[1])
        # BatchNorm2d training mode: biased per-channel stats over all pixels.
        mean = jnp.sum(y, axis=1, keepdims=True) * inv_m            # (Cout, 1)
        var = jnp.sum(y * y, axis=1, keepdims=True) * inv_m - mean * mean
        inv_std = jax.lax.rsqrt(var + EPS)
        scale = inv_std * gamma_ref[...]                 # (Cout, 1)
        shift = beta_ref[...] - mean * scale             # (Cout, 1)
        o_ref[...] = y * scale + shift


def conv1x1_bn(x_nchw, weight_oihw, gamma, beta):
    """x_nchw: (1, Cin, H, W); weight_oihw: (Cout, Cin, 1, 1); gamma/beta: (Cout,)"""
    n, cin, h, w = x_nchw.shape
    cout = weight_oihw.shape[0]
    # Transpose-free reshape is only valid for N=1 (NCHW with N=1 is channels-major).
    # TODO(synk): for N>1 add a batch grid axis (or NHWC transform) instead of this view.
    assert n == 1, "kernel assumes batch size 1 (matches the module's input spec)"
    m = h * w

    x2d = x_nchw.reshape(cin, m)                               # (Cin, M)   zero-cost view
    w2d = weight_oihw.reshape(cout, cin)                       # (Cout, Cin) no transpose
    g2d = gamma.reshape(cout, 1).astype(jnp.float32)
    b2d = beta.reshape(cout, 1).astype(jnp.float32)

    tk = 128
    assert cin % tk == 0
    nk = cin // tk

    out2d = pl.pallas_call(
        conv1x1_bn_kernel,
        out_shape=jax.ShapeDtypeStruct((cout, m), jnp.float32),
        grid=(nk,),
        in_specs=[
            pl.BlockSpec((cout, tk), lambda k: (0, k)),        # W tile
            pl.BlockSpec((tk, m), lambda k: (k, 0)),           # X tile
            pl.BlockSpec((cout, 1), lambda k: (0, 0)),         # gamma
            pl.BlockSpec((cout, 1), lambda k: (0, 0)),         # beta
        ],
        out_specs=pl.BlockSpec((cout, m), lambda k: (0, 0)),   # resident accumulator
        compiler_params=pltpu.CompilerParams(
            dimension_semantics=("arbitrary",)),               # K is a reduction axis
        cost_estimate=pl.CostEstimate(
            flops=2 * m * cin * cout,
            transcendentals=cout,
            bytes_accessed=(cin * m + cout * cin + cout * m + 2 * cout) * 4),
    )(w2d, x2d, g2d, b2d)

    return out2d.reshape(n, cout, h, w)                        # back to NCHW, no transpose


def reference(x_nchw, weight_oihw, gamma, beta):
    # Pure-JAX reference matching PyTorch Conv2d(1x1) + BatchNorm2d (training mode).
    n, cin, h, w = x_nchw.shape
    cout = weight_oihw.shape[0]
    x2d = jnp.transpose(x_nchw, (0, 2, 3, 1)).reshape(-1, cin)
    y = x2d @ weight_oihw.reshape(cout, cin).T
    mean = jnp.mean(y, axis=0, keepdims=True)
    var = jnp.mean((y - mean) ** 2, axis=0, keepdims=True)     # biased variance
    y = (y - mean) / jnp.sqrt(var + EPS) * gamma + beta
    return jnp.transpose(y.reshape(n, h, w, cout), (0, 3, 1, 2))


if __name__ == "__main__":
    key = jax.random.PRNGKey(0)
    k_x, k_w, k_g, k_b = jax.random.split(key, 4)

    N, CIN, H, W = 1, 384, 28, 28
    COUT = 64

    x = jax.random.normal(k_x, (N, CIN, H, W), dtype=jnp.float32)
    # Synthetic params (shapes match Conv2d(384,64,1,1,bias=False) + BatchNorm2d(64))
    weight = jax.random.normal(k_w, (COUT, CIN, 1, 1), dtype=jnp.float32) * 0.05
    gamma = 1.0 + 0.1 * jax.random.normal(k_g, (COUT,), dtype=jnp.float32)
    beta = 0.1 * jax.random.normal(k_b, (COUT,), dtype=jnp.float32)

    out = conv1x1_bn(x, weight, gamma, beta)
    out = jax.block_until_ready(out)

    ref = reference(x, weight, gamma, beta)
    assert out.shape == (N, COUT, H, W)
    assert jnp.allclose(out, ref, atol=1e-3, rtol=1e-3)

    print("KERNEL_OK")
</pallas_src>

<mosaic_0001>
module attributes {stable_mosaic.version = 11 : i64} {
  func.func @conv1x1_bn_kernel(%arg0: i32, %arg1: memref<64x128xf32, #tpu.memory_space<vmem>>, %arg2: memref<128x784xf32, #tpu.memory_space<vmem>>, %arg3: memref<64x1xf32, #tpu.memory_space<vmem>>, %arg4: memref<64x1xf32, #tpu.memory_space<vmem>>, %arg5: memref<64x784xf32, #tpu.memory_space<vmem>>) attributes {dimension_semantics = [#tpu.dimension_semantics<arbitrary>], iteration_bounds = array<i64: 3>, scalar_prefetch = 0 : i64, scratch_operands = 0 : i64, tpu.core_type = #tpu.core_type<tc>, window_params = [{transform_indices = @transform_0, window_bounds = array<i64: 64, 128>}, {transform_indices = @transform_1, window_bounds = array<i64: 128, 784>}, {pipeline_mode = #tpu.pipeline_mode<synchronous>, transform_indices = @transform_2, window_bounds = array<i64: 64, 1>}, {pipeline_mode = #tpu.pipeline_mode<synchronous>, transform_indices = @transform_3, window_bounds = array<i64: 64, 1>}, {pipeline_mode = #tpu.pipeline_mode<synchronous>, transform_indices = @transform_4, window_bounds = array<i64: 64, 784>}]} {
    %c0_i32 = arith.constant 0 : i32
    %0 = arith.cmpi eq, %arg0, %c0_i32 : i32
    %1 = arith.extui %0 : i1 to i32
    %c0_i32_0 = arith.constant 0 : i32
    %2 = arith.cmpi ne, %1, %c0_i32_0 : i32
    scf.if %2 {
      %cst_9 = arith.constant 0.000000e+00 : f32
      %12 = vector.broadcast %cst_9 : f32 to vector<64x784xf32>
      %c0_10 = arith.constant 0 : index
      %c0_11 = arith.constant 0 : index
      %13 = vector.load %arg5[%c0_10, %c0_11] : memref<64x784xf32, #tpu.memory_space<vmem>>, vector<64x784xf32>
      tpu.vector_store %arg5[%c0_10, %c0_11], %12 {strides = array<i32>} : memref<64x784xf32, #tpu.memory_space<vmem>>, vector<64x784xf32>,
    } else {
    }
    %c0 = arith.constant 0 : index
    %c0_1 = arith.constant 0 : index
    %3 = vector.load %arg5[%c0, %c0_1] : memref<64x784xf32, #tpu.memory_space<vmem>>, vector<64x784xf32>
    %c0_2 = arith.constant 0 : index
    %c0_3 = arith.constant 0 : index
    %4 = vector.load %arg1[%c0_2, %c0_3] : memref<64x128xf32, #tpu.memory_space<vmem>>, vector<64x128xf32>
    %c0_4 = arith.constant 0 : index
    %c0_5 = arith.constant 0 : index
    %5 = vector.load %arg2[%c0_4, %c0_5] : memref<128x784xf32, #tpu.memory_space<vmem>>, vector<128x784xf32>
    %cst = arith.constant dense<0.000000e+00> : vector<64x784xf32>
    %6 = tpu.matmul %4, %5, %cst {dimension_numbers = #tpu.dot_dimension_numbers<[1], [0], [0], [1], [0, 0, 1, 1], [], []>} : vector<64x128xf32>, vector<128x784xf32>, vector<64x784xf32> -> vector<64x784xf32>
    %7 = arith.addf %3, %6 : vector<64x784xf32>
    %c0_6 = arith.constant 0 : index
    %c0_7 = arith.constant 0 : index
    %8 = vector.load %arg5[%c0_6, %c0_7] : memref<64x784xf32, #tpu.memory_space<vmem>>, vector<64x784xf32>
    tpu.vector_store %arg5[%c0_6, %c0_7], %7 {strides = array<i32>} : memref<64x784xf32, #tpu.memory_space<vmem>>, vector<64x784xf32>,
    %c2_i32 = arith.constant 2 : i32
    %9 = arith.cmpi eq, %arg0, %c2_i32 : i32
    %10 = arith.extui %9 : i1 to i32
    %c0_i32_8 = arith.constant 0 : i32
    %11 = arith.cmpi ne, %10, %c0_i32_8 : i32
    scf.if %11 {
      %c0_9 = arith.constant 0 : index
      %c0_10 = arith.constant 0 : index
      %12 = vector.load %arg5[%c0_9, %c0_10] : memref<64x784xf32, #tpu.memory_space<vmem>>, vector<64x784xf32>
      %cst_11 = arith.constant dense<0.000000e+00> : vector<64xf32>
      %13 = vector.multi_reduction <add>, %12, %cst_11 [1] : vector<64x784xf32> to vector<64xf32>
      %14 = vector.shape_cast %13 : vector<64xf32> to vector<64x1xf32>
      %cst_12 = arith.constant 0.00127551018 : f32
      %15 = vector.broadcast %cst_12 : f32 to vector<64x1xf32>
      %16 = arith.mulf %14, %15 : vector<64x1xf32>
      %17 = arith.mulf %12, %12 : vector<64x784xf32>
      %cst_13 = arith.constant dense<0.000000e+00> : vector<64xf32>
      %18 = vector.multi_reduction <add>, %17, %cst_13 [1] : vector<64x784xf32> to vector<64xf32>
      %19 = vector.shape_cast %18 : vector<64xf32> to vector<64x1xf32>
      %cst_14 = arith.constant 0.00127551018 : f32
      %20 = vector.broadcast %cst_14 : f32 to vector<64x1xf32>
      %21 = arith.mulf %19, %20 : vector<64x1xf32>
      %22 = arith.mulf %16, %16 : vector<64x1xf32>
      %23 = arith.subf %21, %22 : vector<64x1xf32>
      %cst_15 = arith.constant 9.99999974E-6 : f32
      %24 = vector.broadcast %cst_15 : f32 to vector<64x1xf32>
      %25 = arith.addf %23, %24 : vector<64x1xf32>
      %26 = math.rsqrt %25 : vector<64x1xf32>
      %c0_16 = arith.constant 0 : index
      %c0_17 = arith.constant 0 : index
      %27 = vector.load %arg3[%c0_16, %c0_17] : memref<64x1xf32, #tpu.memory_space<vmem>>, vector<64x1xf32>
      %28 = arith.mulf %26, %27 : vector<64x1xf32>
      %c0_18 = arith.constant 0 : index
      %c0_19 = arith.constant 0 : index
      %29 = vector.load %arg4[%c0_18, %c0_19] : memref<64x1xf32, #tpu.memory_space<vmem>>, vector<64x1xf32>
      %30 = arith.mulf %16, %28 : vector<64x1xf32>
      %31 = arith.subf %29, %30 : vector<64x1xf32>
      %32 = vector.broadcast %28 : vector<64x1xf32> to vector<64x784xf32>
      %33 = arith.mulf %12, %32 : vector<64x784xf32>
      %34 = vector.broadcast %31 : vector<64x1xf32> to vector<64x784xf32>
      %35 = arith.addf %33, %34 : vector<64x784xf32>
      %c0_20 = arith.constant 0 : index
      %c0_21 = arith.constant 0 : index
      %36 = vector.load %arg5[%c0_20, %c0_21] : memref<64x784xf32, #tpu.memory_space<vmem>>, vector<64x784xf32>
      tpu.vector_store %arg5[%c0_20, %c0_21], %35 {strides = array<i32>} : memref<64x784xf32, #tpu.memory_space<vmem>>, vector<64x784xf32>,
    } else {
    }
    return
  }
  func.func @transform_0(%arg0: i32) -> (i32, i32) {
    %c0_i32 = arith.constant 0 : i32
    %c0_i32_0 = arith.constant 0 : i32
    return %c0_i32, %arg0 : i32, i32
  }
  func.func @transform_1(%arg0: i32) -> (i32, i32) {
    %c0_i32 = arith.constant 0 : i32
    %c0_i32_0 = arith.constant 0 : i32
    return %arg0, %c0_i32 : i32, i32
  }
  func.func @transform_2(%arg0: i32) -> (i32, i32) {
    %c0_i32 = arith.constant 0 : i32
    %c0_i32_0 = arith.constant 0 : i32
    %c0_i32_1 = arith.constant 0 : i32
    return %c0_i32, %c0_i32_0 : i32, i32
  }
  func.func @transform_3(%arg0: i32) -> (i32, i32) {
    %c0_i32 = arith.constant 0 : i32
    %c0_i32_0 = arith.constant 0 : i32
    %c0_i32_1 = arith.constant 0 : i32
    return %c0_i32, %c0_i32_0 : i32, i32
  }
  func.func @transform_4(%arg0: i32) -> (i32, i32) {
    %c0_i32 = arith.constant 0 : i32
    %c0_i32_0 = arith.constant 0 : i32
    %c0_i32_1 = arith.constant 0 : i32
    return %c0_i32, %c0_i32_0 : i32, i32
  }
}

</mosaic_0001>

<bundles_post_ra>
// kernel: tpu_custom_call.1
= control target key start
LH: loop header
LB: loop body
LE: loop exit
PB: predicated region body
PF: predicated region fallthrough
CT: control target
= control target key end

     0   :  { %9 = vsyncpa [#allocation4], 0  ;;  %s1866_s15 = smov 0   ;;  %s1868_s16 = smov 0   ;;  %s2731_s0 = inlined_call_operand.vmem [shape: f32[64,384], index: 0, kind: input, shape index: {}]   ;;  %s2732_s1 = inlined_call_operand.vmem [shape: f32[384,784], index: 1, kind: input, shape index: {}]   ;;  %s2733_s2 = inlined_call_operand.vmem [shape: f32[64,1], index: 2, kind: input, shape index: {}]   ;;  %s2734_s3 = inlined_call_operand.vmem [shape: f32[64,1], index: 3, kind: input, shape index: {}]   ;;  %s2735_s4 = inlined_call_operand.hbm [shape: f32[64,784], index: 4, kind: output, shape index: {}]  }
   0x1   :  { %s1870_s17 = smov 0  }
   0x2 LB: > { %s1882_s18 = sadd.s32 4294967295, %s1834_s17   ;;  %s1885_s19 = sadd.s32 1, %s1834_s17   ;;  %s1834_s17 = sphi %s1870_s17, %s2771_s17   ;;  %s1830_s16 = sphi %s1868_s16, %s2770_s16   ;;  %s1826_s15 = sphi %s1866_s15, %s2769_s15  }
   0x3   : > { %s19_s20 = ssub.s32 %s1834_s17, %s1885_s19  ;;  %s22_s21 = sadd.s32 1, %s1830_s16 }
   0x4   : > { %p20_p0 = scmp.eq.s32.totalorder %s19_s20, 0  ;;  %p29_p1 = scmp.ne.s32.totalorder %s1830_s16, %s1826_s15 }
   0x5   : > { %p30_p2 = scmp.eq.s32.totalorder %s1834_s17, 0  ;;  %p1647_p4 = scmp.ge.s32.totalorder %s1834_s17, 3 }
   0x6   : > { %s1894_s22 = scalar_select %p20_p0, %s1830_s16, %s22_s21  }
   0x7   : > { %p31_p3 = por %p30_p2, %p29_p1  ;;  %150 = sbr.rel (%p1647_p4) target bundleno = 24 (0x18), region = 24 }
   0xc   : > { %153 = sbr.rel (!%p31_p3) target bundleno = 24 (0x18), region = 28  ;;  %s155_s23 = sand.u32 (%p31_p3), 1, %s1830_s16  }
   0xd   : > { %s1649_s24 = sshll.u32 (%p31_p3), %s1834_s17, 3  ;;  %s1648_s25 = sshll.u32 (%p31_p3), %s155_s23, 6 }
   0xe   : > { %s159_s28 = scalar_lea.vmem (%p31_p3), %s2731_s0, %s1649_s24  ;;  %s157_s29 = scalar_lea.vmem (%p31_p3), [#allocation2], %s1648_s25 }
   0xf   : > { %v202_v0 = vld [vmem:[%s159_s28] sm:$0xff] (%p31_p3)  ;;  %v204_v1 = vld [vmem:[%s159_s28 + $0x18] sm:$0xff] (%p31_p3)  ;;  %v206_v2 = vld [vmem:[%s159_s28 + $0x30] sm:$0xff] (%p31_p3) }
  0x10   : > { %203 = vst [vmem:[%s157_s29] sm:$0xff] (%p31_p3), %v202_v0  ;;  %v208_v3 = vld [vmem:[%s159_s28 + $0x48] sm:$0xff] (%p31_p3)  ;;  %v210_v4 = vld [vmem:[%s159_s28 + $0x60] sm:$0xff] (%p31_p3)  ;;  %v212_v5 = vld [vmem:[%s159_s28 + $0x78] sm:$0xff] (%p31_p3) }
  0x11   : > { %205 = vst [vmem:[%s157_s29 + $0x8] sm:$0xff] %v204_v1  ;;  %v214_v6 = vld [vmem:[%s159_s28 + $0x90] sm:$0xff]  ;;  %v216_v7 = vld [vmem:[%s159_s28 + $0xa8] sm:$0xff] }
  0x12   : > { %207 = vst [vmem:[%s157_s29 + $0x10] sm:$0xff] %v206_v2 }
  0x13   : > { %209 = vst [vmem:[%s157_s29 + $0x18] sm:$0xff] %v208_v3 }
  0x14   : > { %211 = vst [vmem:[%s157_s29 + $0x20] sm:$0xff] %v210_v4 }
  0x15   : > { %213 = vst [vmem:[%s157_s29 + $0x28] sm:$0xff] %v212_v5 }
  0x16   : > { %215 = vst [vmem:[%s157_s29 + $0x30] sm:$0xff] %v214_v6 }
  0x17   : > { %217 = vst [vmem:[%s157_s29 + $0x38] sm:$0xff] %v216_v7 }
  0x18 PF: > { %p1650_p5 = scmp.ge.s32.totalorder %s1834_s17, 1  ;;  %p232_p6 = scmp.lt.s32.totalorder %s1834_s17, 4 }
  0x1a   : > { %p233_p7 = pnand %p1650_p5, %p232_p6 }
  0x1b   : > { %s239_s30 = sand.u32 (!%p233_p7), 1, %s1826_s15   ;;  %s1652_s5 = sshll.u32 (!%p233_p7), %s1882_s18, 4 }
  0x1c   : > { %236 = sbr.rel (%p233_p7) target bundleno = 737 (0x2e1), region = 70  ;;  %s1651_s6 = sshll.u32 (!%p233_p7), %s239_s30, 6 }
  0x1d   : > { %p266_p8 = scmp.lt.s32.totalorder (!%p233_p7), %s1652_s5, 47  ;;  %s1911_s11 = scalar_lea.vmem (!%p233_p7), [#allocation2], %s1651_s6 }
  0x1e   : > { %p1654_p9 = scmp.ne.s32.totalorder (!%p233_p7), %s1882_s18, 0 }
  0x21   : > { %s2773_s5 = smov (!%p266_p8, %s1652_s5), 47  ;;  %275 = sbr.rel (%p1654_p9) target bundleno = 95 (0x5f), region = 78 }
  0x22   : > { %s1708_s7 = smul.u32 56, %s2773_s5 }
  0x24   : > { %s1909_s10 = scalar_lea.vmem %s2732_s1, %s1708_s7 }
  0x26   : > { %v1836_v8 = vmov 0.0   ;;  %vm282_vm0 = vcmask 130048  }
  0x27   : > { %276 = vst [vmem:[#allocation3] sm:$0xff] %v1836_v8 }
  0x28   : > { %277 = vst [vmem:[#allocation3 + $0x8] sm:$0xff] %v1836_v8 }
  0x29   : > { %278 = vst [vmem:[#allocation3 + $0x10] sm:$0xff] %v1836_v8 }
  0x2a   : > { %279 = vst [vmem:[#allocation3 + $0x18] sm:$0xff] %v1836_v8 }
  0x2b   : > { %280 = vst [vmem:[#allocation3 + $0x20] sm:$0xff] %v1836_v8 }
  0x2c   : > { %281 = vst [vmem:[#allocation3 + $0x28] sm:$0xff] %v1836_v8 }
  0x2d   : > { %284 = vst [vmem:[#allocation3 + $0x38] sm:$0xff] %v1836_v8 }
  0x2e   : > { %285 = vst [vmem:[#allocation3 + $0x40] sm:$0xff] %v1836_v8 }
  0x2f   : > { %286 = vst [vmem:[#allocation3 + $0x48] sm:$0xff] %v1836_v8 }
  0x30   : > { %287 = vst [vmem:[#allocation3 + $0x50] sm:$0xff] %v1836_v8 }
  0x31   : > { %288 = vst [vmem:[#allocation3 + $0x58] sm:$0xff] %v1836_v8 }
  0x32   : > { %289 = vst [vmem:[#allocation3 + $0x60] sm:$0xff] %v1836_v8 }
  0x33   : > { %291 = vst [vmem:[#allocation3 + $0x70] sm:$0xff] %v1836_v8 }
  0x34   : > { %292 = vst [vmem:[#allocation3 + $0x78] sm:$0xff] %v1836_v8 }
  0x35   : > { %293 = vst [vmem:[#allocation3 + $0x80] sm:$0xff] %v1836_v8 }
  0x36   : > { %294 = vst [vmem:[#allocation3 + $0x88] sm:$0xff] %v1836_v8 }
  0x37   : > { %295 = vst [vmem:[#allocation3 + $0x90] sm:$0xff] %v1836_v8 }
  0x38   : > { %296 = vst [vmem:[#allocation3 + $0x98] sm:$0xff] %v1836_v8 }
  0x39   : > { %298 = vst [vmem:[#allocation3 + $0xa8] sm:$0xff] %v1836_v8 }
  0x3a   : > { %299 = vst [vmem:[#allocation3 + $0xb0] sm:$0xff] %v1836_v8 }
  0x3b   : > { %300 = vst [vmem:[#allocation3 + $0xb8] sm:$0xff] %v1836_v8 }
  0x3c   : > { %301 = vst [vmem:[#allocation3 + $0xc0] sm:$0xff] %v1836_v8 }
  0x3d   : > { %302 = vst [vmem:[#allocation3 + $0xc8] sm:$0xff] %v1836_v8 }
  0x3e   : > { %303 = vst [vmem:[#allocation3 + $0xd0] sm:$0xff] %v1836_v8 }
  0x3f   : > { %305 = vst [vmem:[#allocation3 + $0xe0] sm:$0xff] %v1836_v8 }
  0x40   : > { %306 = vst [vmem:[#allocation3 + $0xe8] sm:$0xff] %v1836_v8 }
  0x41   : > { %307 = vst [vmem:[#allocation3 + $0xf0] sm:$0xff] %v1836_v8 }
  0x42   : > { %308 = vst [vmem:[#allocation3 + $0xf8] sm:$0xff] %v1836_v8 }
  0x43   : > { %309 = vst [vmem:[#allocation3 + $0x100] sm:$0xff] %v1836_v8 }
  0x44   : > { %310 = vst [vmem:[#allocation3 + $0x108] sm:$0xff] %v1836_v8 }
  0x45   : > { %312 = vst [vmem:[#allocation3 + $0x118] sm:$0xff] %v1836_v8 }
  0x46   : > { %313 = vst [vmem:[#allocation3 + $0x120] sm:$0xff] %v1836_v8 }
  0x47   : > { %314 = vst [vmem:[#allocation3 + $0x128] sm:$0xff] %v1836_v8 }
  0x48   : > { %315 = vst [vmem:[#allocation3 + $0x130] sm:$0xff] %v1836_v8 }
  0x49   : > { %316 = vst [vmem:[#allocation3 + $0x138] sm:$0xff] %v1836_v8 }
  0x4a   : > { %317 = vst [vmem:[#allocation3 + $0x140] sm:$0xff] %v1836_v8 }
  0x4b   : > { %319 = vst [vmem:[#allocation3 + $0x150] sm:$0xff] %v1836_v8 }
  0x4c   : > { %320 = vst [vmem:[#allocation3 + $0x158] sm:$0xff] %v1836_v8 }
  0x4d   : > { %321 = vst [vmem:[#allocation3 + $0x160] sm:$0xff] %v1836_v8 }
  0x4e   : > { %322 = vst [vmem:[#allocation3 + $0x168] sm:$0xff] %v1836_v8 }
  0x4f   : > { %323 = vst [vmem:[#allocation3 + $0x170] sm:$0xff] %v1836_v8 }
  0x50   : > { %324 = vst [vmem:[#allocation3 + $0x178] sm:$0xff] %v1836_v8 }
  0x51   : > { %326 = vst [vmem:[#allocation3 + $0x188] sm:$0xff] %v1836_v8 }
  0x52   : > { %327 = vst [vmem:[#allocation3 + $0x190] sm:$0xff] %v1836_v8 }
  0x53   : > { %328 = vst [vmem:[#allocation3 + $0x198] sm:$0xff] %v1836_v8 }
  0x54   : > { %329 = vst [vmem:[#allocation3 + $0x1a0] sm:$0xff] %v1836_v8 }
  0x55   : > { %330 = vst [vmem:[#allocation3 + $0x1a8] sm:$0xff] %v1836_v8 }
  0x56   : > { %331 = vst [vmem:[#allocation3 + $0x1b0] sm:$0xff] %v1836_v8 }
  0x57   : > { %283 = vst.msk [vmem:[#allocation3 + $0x30] sm:$0xff] %vm282_vm0, %v1836_v8 }
  0x58   : > { %290 = vst.msk [vmem:[#allocation3 + $0x68] sm:$0xff] %vm282_vm0, %v1836_v8 }
  0x59   : > { %297 = vst.msk [vmem:[#allocation3 + $0xa0] sm:$0xff] %vm282_vm0, %v1836_v8 }
  0x5a   : > { %304 = vst.msk [vmem:[#allocation3 + $0xd8] sm:$0xff] %vm282_vm0, %v1836_v8 }
  0x5b   : > { %311 = vst.msk [vmem:[#allocation3 + $0x110] sm:$0xff] %vm282_vm0, %v1836_v8 }
  0x5c   : > { %318 = vst.msk [vmem:[#allocation3 + $0x148] sm:$0xff] %vm282_vm0, %v1836_v8 }
  0x5d   : > { %325 = vst.msk [vmem:[#allocation3 + $0x180] sm:$0xff] %vm282_vm0, %v1836_v8 }
  0x5e   : > { %332 = vst.msk [vmem:[#allocation3 + $0x1b8] sm:$0xff] %vm282_vm0, %v1836_v8 }
  0x5f PF: > { %v502_v9 = vld [vmem:[%s1909_s10 + $0x348] sm:$0xff]  ;;  %v504_v10 = vld [vmem:[%s1909_s10 + $0x358] sm:$0xff]  ;;  %v495_v11 = vld [vmem:[%s1909_s10 + $0x310] sm:$0xff]  ;;  %vm858_vm1 = vcmask 130048   ;;  %p1655_p10 = scmp.ne.s32.totalorder %s1882_s18, 2 }
  0x60   : > { %1660 = vmatpush.msra.mxu3 %v502_v9  ;;  %591 = vmatpush.msra.mxu2 %v504_v10  ;;  %v497_v12 = vld [vmem:[%s1909_s10 + $0x320] sm:$0xff]  ;;  %v488_v13 = vld [vmem:[%s1909_s10 + $0x2d8] sm:$0xff]  ;;  %v490_v14 = vld [vmem:[%s1909_s10 + $0x2e8] sm:$0xff] }
  0x61   : > { %509 = vmatpush.msra.mxu0 %v502_v9  ;;  %v503_v15 = vld [vmem:[%s1909_s10 + $0x350] sm:$0xff]  ;;  %v496_v16 = vld [vmem:[%s1909_s10 + $0x318] sm:$0xff]  ;;  %v481_v17 = vld [vmem:[%s1909_s10 + $0x2a0] sm:$0xff] }
  0x62   : > { %1661 = vmatpush.msra.mxu3 %v495_v11  ;;  %592 = vmatpush.msra.mxu2 %v497_v12  ;;  %v483_v18 = vld [vmem:[%s1909_s10 + $0x2b0] sm:$0xff]  ;;  %v489_v19 = vld [vmem:[%s1909_s10 + $0x2e0] sm:$0xff]  ;;  %v474_v20 = vld [vmem:[%s1909_s10 + $0x268] sm:$0xff] }
  0x63   : > { %550 = vmatpush.msra.mxu1 %v503_v15  ;;  %510 = vmatpush.msra.mxu0 %v495_v11  ;;  %v476_v21 = vld [vmem:[%s1909_s10 + $0x278] sm:$0xff]  ;;  %v482_v22 = vld [vmem:[%s1909_s10 + $0x2a8] sm:$0xff]  ;;  %v467_v23 = vld [vmem:[%s1909_s10 + $0x230] sm:$0xff] }
  0x64   : > { %1662 = vmatpush.msra.mxu3 %v488_v13  ;;  %593 = vmatpush.msra.mxu2 %v490_v14  ;;  %v469_v24 = vld [vmem:[%s1909_s10 + $0x240] sm:$0xff]  ;;  %v475_v25 = vld [vmem:[%s1909_s10 + $0x270] sm:$0xff]  ;;  %v460_v26 = vld [vmem:[%s1909_s10 + $0x1f8] sm:$0xff] }
  0x65   : > { %551 = vmatpush.msra.mxu1 %v496_v16  ;;  %511 = vmatpush.msra.mxu0 %v488_v13  ;;  %v462_v27 = vld [vmem:[%s1909_s10 + $0x208] sm:$0xff]  ;;  %v468_v28 = vld [vmem:[%s1909_s10 + $0x238] sm:$0xff]  ;;  %v453_v29 = vld [vmem:[%s1909_s10 + $0x1c0] sm:$0xff] }
  0x66   : > { %1663 = vmatpush.msra.mxu3 %v481_v17  ;;  %594 = vmatpush.msra.mxu2 %v483_v18  ;;  %v455_v30 = vld [vmem:[%s1909_s10 + $0x1d0] sm:$0xff]  ;;  %v461_v31 = vld [vmem:[%s1909_s10 + $0x200] sm:$0xff]  ;;  %v446_v32 = vld [vmem:[%s1909_s10 + $0x188] sm:$0xff] }
  0x67   : > { %552 = vmatpush.msra.mxu1 %v489_v19  ;;  %512 = vmatpush.msra.mxu0 %v481_v17  ;;  %v448_v33 = vld [vmem:[%s1909_s10 + $0x198] sm:$0xff]  ;;  %v454_v34 = vld [vmem:[%s1909_s10 + $0x1c8] sm:$0xff]  ;;  %v439_v35 = vld [vmem:[%s1909_s10 + $0x150] sm:$0xff] }
  0x68   : > { %1664 = vmatpush.msra.mxu3 %v474_v20  ;;  %595 = vmatpush.msra.mxu2 %v476_v21  ;;  %v441_v36 = vld [vmem:[%s1909_s10 + $0x160] sm:$0xff]  ;;  %v447_v37 = vld [vmem:[%s1909_s10 + $0x190] sm:$0xff]  ;;  %v432_v38 = vld [vmem:[%s1909_s10 + $0x118] sm:$0xff] }
  0x69   : > { %553 = vmatpush.msra.mxu1 %v482_v22  ;;  %513 = vmatpush.msra.mxu0 %v474_v20  ;;  %v434_v39 = vld [vmem:[%s1909_s10 + $0x128] sm:$0xff]  ;;  %v440_v40 = vld [vmem:[%s1909_s10 + $0x158] sm:$0xff]  ;;  %v425_v41 = vld [vmem:[%s1909_s10 + $0xe0] sm:$0xff] }
  0x6a   : > { %1665 = vmatpush.msra.mxu3 %v467_v23  ;;  %596 = vmatpush.msra.mxu2 %v469_v24  ;;  %v427_v42 = vld [vmem:[%s1909_s10 + $0xf0] sm:$0xff]  ;;  %v433_v43 = vld [vmem:[%s1909_s10 + $0x120] sm:$0xff]  ;;  %v418_v44 = vld [vmem:[%s1909_s10 + $0xa8] sm:$0xff] }
  0x6b   : > { %554 = vmatpush.msra.mxu1 %v475_v25  ;;  %514 = vmatpush.msra.mxu0 %v467_v23  ;;  %v420_v45 = vld [vmem:[%s1909_s10 + $0xb8] sm:$0xff]  ;;  %v426_v46 = vld [vmem:[%s1909_s10 + $0xe8] sm:$0xff]  ;;  %v411_v47 = vld [vmem:[%s1909_s10 + $0x70] sm:$0xff] }
  0x6c   : > { %1666 = vmatpush.msra.mxu3 %v460_v26  ;;  %597 = vmatpush.msra.mxu2 %v462_v27  ;;  %v413_v48 = vld [vmem:[%s1909_s10 + $0x80] sm:$0xff]  ;;  %v419_v49 = vld [vmem:[%s1909_s10 + $0xb0] sm:$0xff]  ;;  %v404_v50 = vld [vmem:[%s1909_s10 + $0x38] sm:$0xff] }
  0x6d   : > { %555 = vmatpush.msra.mxu1 %v468_v28  ;;  %515 = vmatpush.msra.mxu0 %v460_v26  ;;  %v406_v51 = vld [vmem:[%s1909_s10 + $0x48] sm:$0xff]  ;;  %v412_v52 = vld [vmem:[%s1909_s10 + $0x78] sm:$0xff]  ;;  %v397_v53 = vld [vmem:[%s1909_s10] sm:$0xff] }
  0x6e   : > { %1667 = vmatpush.msra.mxu3 %v453_v29  ;;  %598 = vmatpush.msra.mxu2 %v455_v30  ;;  %v399_v54 = vld [vmem:[%s1909_s10 + $0x10] sm:$0xff]  ;;  %v1961_v55 = vld [vmem:[%s1911_s11 + $0x20] sm:$0xff]  ;;  %v1968_v58 = vld [vmem:[%s1909_s10 + $0x378] sm:$0xff] }
  0x6f   : > { %556 = vmatpush.msra.mxu1 %v461_v31  ;;  %516 = vmatpush.msra.mxu0 %v453_v29  ;;  %v1964_v56 = vld [vmem:[%s1911_s11] sm:$0xff]  ;;  %v498_v60 = vld [vmem:[%s1909_s10 + $0x328] sm:$0xff]  ;;  %v491_v63 = vld [vmem:[%s1909_s10 + $0x2f0] sm:$0xff] }
  0x70   : > { %1668 = vmatpush.msra.mxu3 %v446_v32  ;;  %599 = vmatpush.msra.mxu2 %v448_v33  ;;  %v505_v57 = vld [vmem:[%s1909_s10 + $0x360] sm:$0xff]  ;;  %v398_v62 = vld [vmem:[%s1909_s10 + $0x8] sm:$0xff]  ;;  %v1983_v1 = vld [vmem:[%s1909_s10 + $0x370] sm:$0xff] }
  0x71   : > { %557 = vmatpush.msra.mxu1 %v454_v34  ;;  %517 = vmatpush.msra.mxu0 %v446_v32  ;;  %v405_v59 = vld [vmem:[%s1909_s10 + $0x40] sm:$0xff]  ;;  %v506_v0 = vld [vmem:[%s1909_s10 + $0x368] sm:$0xff]  ;;  %v484_v2 = vld [vmem:[%s1909_s10 + $0x2b8] sm:$0xff] }
  0x72   : > { %1669 = vmatpush.msra.mxu3 %v439_v35  ;;  %600 = vmatpush.msra.mxu2 %v441_v36  ;;  %v1975_v61 = vld [vmem:[%s1909_s10 + $0x340] sm:$0xff]  ;;  %v1988_v3 = vld [vmem:[%s1909_s10 + $0x308] sm:$0xff]  ;;  %v499_v7 = vld [vmem:[%s1909_s10 + $0x330] sm:$0xff] }
  0x73   : > { %558 = vmatpush.msra.mxu1 %v447_v37  ;;  %518 = vmatpush.msra.mxu0 %v439_v35  ;;  %v1992_v4 = vld [vmem:[%s1911_s11 + $0x28] sm:$0xff]  ;;  %v477_v6 = vld [vmem:[%s1909_s10 + $0x280] sm:$0xff]  ;;  %v2002_v8 = vld [vmem:[%s1909_s10 + $0x338] sm:$0xff] }
  0x74   : > { %1670 = vmatpush.msra.mxu3 %v432_v38  ;;  %601 = vmatpush.msra.mxu2 %v434_v39  ;;  %v1995_v5 = vld [vmem:[%s1911_s11 + $0x8] sm:$0xff]  ;;  %v2005_v9 = vld [vmem:[%s1909_s10 + $0x2d0] sm:$0xff]  ;;  %v492_v11 = vld [vmem:[%s1909_s10 + $0x2f8] sm:$0xff] }
  0x75   : > { %559 = vmatpush.msra.mxu1 %v440_v40  ;;  %519 = vmatpush.msra.mxu0 %v432_v38  ;;  %v470_v10 = vld [vmem:[%s1909_s10 + $0x248] sm:$0xff]  ;;  %v2012_v12 = vld [vmem:[%s1909_s10 + $0x300] sm:$0xff]  ;;  %v463_v13 = vld [vmem:[%s1909_s10 + $0x210] sm:$0xff] }
  0x76   : > { %1671 = vmatpush.msra.mxu3 %v425_v41  ;;  %602 = vmatpush.msra.mxu2 %v427_v42  ;;  %v485_v14 = vld [vmem:[%s1909_s10 + $0x2c0] sm:$0xff]  ;;  %v2019_v15 = vld [vmem:[%s1909_s10 + $0x298] sm:$0xff]  ;;  %v478_v17 = vld [vmem:[%s1909_s10 + $0x288] sm:$0xff] }
  0x77   : > { %560 = vmatpush.msra.mxu1 %v433_v43  ;;  %520 = vmatpush.msra.mxu0 %v425_v41  ;;  %v456_v16 = vld [vmem:[%s1909_s10 + $0x1d8] sm:$0xff]  ;;  %v2026_v18 = vld [vmem:[%s1911_s11 + $0x30] sm:$0xff]  ;;  %v449_v20 = vld [vmem:[%s1909_s10 + $0x1a0] sm:$0xff] }
  0x78   : > { %1672 = vmatpush.msra.mxu3 %v418_v44  ;;  %603 = vmatpush.msra.mxu2 %v420_v45  ;;  %v2029_v19 = vld [vmem:[%s1911_s11 + $0x10] sm:$0xff]  ;;  %v2036_v22 = vld [vmem:[%s1909_s10 + $0x2c8] sm:$0xff]  ;;  %v2039_v23 = vld [vmem:[%s1909_s10 + $0x260] sm:$0xff] }
  0x79   : > { %561 = vmatpush.msra.mxu1 %v426_v46  ;;  %521 = vmatpush.msra.mxu0 %v418_v44  ;;  %v471_v21 = vld [vmem:[%s1909_s10 + $0x250] sm:$0xff]  ;;  %v442_v24 = vld [vmem:[%s1909_s10 + $0x168] sm:$0xff]  ;;  %v464_v25 = vld [vmem:[%s1909_s10 + $0x218] sm:$0xff] }
  0x7a   : > { %1673 = vmatpush.msra.mxu3 %v411_v47  ;;  %604 = vmatpush.msra.mxu2 %v413_v48  ;;  %v2046_v26 = vld [vmem:[%s1909_s10 + $0x290] sm:$0xff]  ;;  %v457_v28 = vld [vmem:[%s1909_s10 + $0x1e0] sm:$0xff]  ;;  %v2053_v29 = vld [vmem:[%s1909_s10 + $0x228] sm:$0xff] }
  0x7b   : > { %562 = vmatpush.msra.mxu1 %v419_v49  ;;  %522 = vmatpush.msra.mxu0 %v411_v47  ;;  %v435_v27 = vld [vmem:[%s1909_s10 + $0x130] sm:$0xff]  ;;  %v428_v30 = vld [vmem:[%s1909_s10 + $0xf8] sm:$0xff]  ;;  %v450_v31 = vld [vmem:[%s1909_s10 + $0x1a8] sm:$0xff] }
  0x7c   : > { %1674 = vmatpush.msra.mxu3 %v404_v50  ;;  %605 = vmatpush.msra.mxu2 %v406_v51  ;;  %v2060_v32 = vld [vmem:[%s1911_s11 + $0x38] sm:$0xff]  ;;  %v421_v34 = vld [vmem:[%s1909_s10 + $0xc0] sm:$0xff]  ;;  %v443_v35 = vld [vmem:[%s1909_s10 + $0x170] sm:$0xff] }
  0x7d   : > { %563 = vmatpush.msra.mxu1 %v412_v52  ;;  %523 = vmatpush.msra.mxu0 %v404_v50  ;;  %v2063_v33 = vld [vmem:[%s1911_s11 + $0x18] sm:$0xff]  ;;  %v2073_v37 = vld [vmem:[%s1909_s10 + $0x1f0] sm:$0xff]  ;;  %v414_v38 = vld [vmem:[%s1909_s10 + $0x88] sm:$0xff] }
  0x7e   : > { %1675 = vmatpush.msra.mxu3 %v397_v53  ;;  %606 = vmatpush.msra.mxu2 %v399_v54  ;;  %v2070_v36 = vld [vmem:[%s1909_s10 + $0x258] sm:$0xff]  ;;  %v2080_v40 = vld [vmem:[%s1909_s10 + $0x220] sm:$0xff]  ;;  %v407_v41 = vld [vmem:[%s1909_s10 + $0x50] sm:$0xff] }
  0x7f   : > { %537 = vmatmul.f32.vlgmr.msra.gmra.mxu3 %v1961_v55  ;;  %607 = vmatmul.f32.vlgmr.msra.gmra.mxu2 %v1964_v56  ;;  %v436_v39 = vld [vmem:[%s1909_s10 + $0x138] sm:$0xff]  ;;  %v429_v42 = vld [vmem:[%s1909_s10 + $0x100] sm:$0xff]  ;;  %v422_v45 = vld [vmem:[%s1909_s10 + $0xc8] sm:$0xff] }
  0x80   : > { %632 = vmatpush.msrb.mxu3 %v505_v57  ;;  %755 = vmatpush.msrb.mxu2 %v1968_v58  ;;  %v2087_v43 = vld [vmem:[%s1909_s10 + $0x1b8] sm:$0xff]  ;;  %v415_v46 = vld [vmem:[%s1909_s10 + $0x90] sm:$0xff]  ;;  %v2097_v47 = vld [vmem:[%s1909_s10 + $0x1e8] sm:$0xff] }
  0x81   : > { %564 = vmatpush.msra.mxu1 %v405_v59  ;;  %524 = vmatpush.msra.mxu0 %v397_v53  ;;  %v400_v44 = vld [vmem:[%s1909_s10 + $0x18] sm:$0xff]  ;;  %v2100_v48 = vld [vmem:[%s1909_s10 + $0x180] sm:$0xff]  ;;  %v451_v50 = vld [vmem:[%s1909_s10 + $0x1b0] sm:$0xff] }
  0x82   : > { %633 = vmatpush.msrb.mxu3 %v498_v60  ;;  %756 = vmatpush.msrb.mxu2 %v1975_v61  ;;  %v408_v49 = vld [vmem:[%s1909_s10 + $0x58] sm:$0xff]  ;;  %v438_v51 = vld [vmem:[%s1909_s10 + $0x148] sm:$0xff]  ;;  %v401_v52 = vld [vmem:[%s1909_s10 + $0x20] sm:$0xff] }
  0x83   : > { %565 = vmatpush.msra.mxu1 %v398_v62  ;;  %525 = vmatmul.f32.vlgmr.msra.gmra.mxu0 %v1964_v56  ;;  %v444_v53 = vld [vmem:[%s1909_s10 + $0x178] sm:$0xff]  ;;  %v431_v54 = vld [vmem:[%s1909_s10 + $0x110] sm:$0xff]  ;;  %v437_v57 = vld [vmem:[%s1909_s10 + $0x140] sm:$0xff] }
  0x84   : > { %634 = vmatpush.msrb.mxu3 %v491_v63  ;;  %566 = vmatmul.f32.vlgmr.msra.gmra.mxu1 %v1964_v56  ;;  %v430_v59 = vld [vmem:[%s1909_s10 + $0x108] sm:$0xff]  ;;  %v417_v60 = vld [vmem:[%s1909_s10 + $0xa0] sm:$0xff]  ;;  %v416_v63 = vld [vmem:[%s1909_s10 + $0x98] sm:$0xff] }
  0x85   : > { %673 = vmatpush.msrb.mxu0 %v506_v0  ;;  %1676 = vmatpush.msrb.mxu1 %v1983_v1  ;;  %v410_v62 = vld [vmem:[%s1909_s10 + $0x68] sm:$0xff]  ;;  %v403_v0 = vld [vmem:[%s1909_s10 + $0x30] sm:$0xff] }
  0x86   : > { %635 = vmatpush.msrb.mxu3 %v484_v2  ;;  %757 = vmatpush.msrb.mxu2 %v1988_v3  ;;  %v402_v2 = vld [vmem:[%s1909_s10 + $0x28] sm:$0xff] }
  0x87   : > { %540 = vmatmul.f32.gmra.mxu3 %v1992_v4  ;;  %610 = vmatmul.f32.gmra.mxu2 %v1995_v5 }
  0x88   : > { %636 = vmatpush.msrb.mxu3 %v477_v6  ;;  %674 = vmatpush.msrb.mxu0 %v499_v7  ;;  %v334_v6 = vld [vmem:[#allocation3 + $0x8] sm:$0xff] }
  0x89   : > { %1677 = vmatpush.msrb.mxu1 %v2002_v8  ;;  %758 = vmatpush.msrb.mxu2 %v2005_v9 }
  0x8a   : > { %637 = vmatpush.msrb.mxu3 %v470_v10  ;;  %675 = vmatpush.msrb.mxu0 %v492_v11 }
  0x8b   : > { %528 = vmatmul.f32.gmra.mxu0 %v1995_v5  ;;  %1678 = vmatpush.msrb.mxu1 %v2012_v12 }
  0x8c   : > { %638 = vmatpush.msrb.mxu3 %v463_v13  ;;  %676 = vmatpush.msrb.mxu0 %v485_v14 }
  0x8d   : > { %569 = vmatmul.f32.gmra.mxu1 %v1995_v5  ;;  %759 = vmatpush.msrb.mxu2 %v2019_v15 }
  0x8e   : > { %639 = vmatpush.msrb.mxu3 %v456_v16  ;;  %677 = vmatpush.msrb.mxu0 %v478_v17  ;;  %v341_v16 = vld [vmem:[#allocation3 + $0x40] sm:$0xff] }
  0x8f   : > { %543 = vmatmul.f32.gmra.mxu3 %v2026_v18  ;;  %613 = vmatmul.f32.gmra.mxu2 %v2029_v19 }
  0x90   : > { %640 = vmatpush.msrb.mxu3 %v449_v20  ;;  %678 = vmatpush.msrb.mxu0 %v471_v21 }
  0x91   : > { %1679 = vmatpush.msrb.mxu1 %v2036_v22  ;;  %760 = vmatpush.msrb.mxu2 %v2039_v23 }
  0x92   : > { %641 = vmatpush.msrb.mxu3 %v442_v24  ;;  %679 = vmatpush.msrb.mxu0 %v464_v25  ;;  %v347_v25 = vld [vmem:[#allocation3 + $0x70] sm:$0xff] }
  0x93   : > { %531 = vmatmul.f32.gmra.mxu0 %v2029_v19  ;;  %1680 = vmatpush.msrb.mxu1 %v2046_v26 }
  0x94   : > { %642 = vmatpush.msrb.mxu3 %v435_v27  ;;  %680 = vmatpush.msrb.mxu0 %v457_v28  ;;  %v375_v27 = vld [vmem:[#allocation3 + $0x150] sm:$0xff]  ;;  %v348_v28 = vld [vmem:[#allocation3 + $0x78] sm:$0xff] }
  0x95   : > { %572 = vmatmul.f32.gmra.mxu1 %v2029_v19  ;;  %761 = vmatpush.msrb.mxu2 %v2053_v29 }
  0x96   : > { %643 = vmatpush.msrb.mxu3 %v428_v30  ;;  %681 = vmatpush.msrb.mxu0 %v450_v31  ;;  %v349_v30 = vld [vmem:[#allocation3 + $0x80] sm:$0xff] }
  0x97   : > { %546 = vmatmul.f32.gmra.mxu3 %v2060_v32  ;;  %616 = vmatmul.f32.gmra.mxu2 %v2063_v33 }
  0x98   : > { %644 = vmatpush.msrb.mxu3 %v421_v34  ;;  %682 = vmatpush.msrb.mxu0 %v443_v35 }
  0x99   : > { %1681 = vmatpush.msrb.mxu1 %v2070_v36  ;;  %762 = vmatpush.msrb.mxu2 %v2073_v37 }
  0x9a   : > { %645 = vmatpush.msrb.mxu3 %v414_v38  ;;  %683 = vmatpush.msrb.mxu0 %v436_v39  ;;  %v382_v39 = vld [vmem:[#allocation3 + $0x188] sm:$0xff] }
  0x9b   : > { %534 = vmatmul.f32.gmra.mxu0 %v2063_v33  ;;  %1682 = vmatpush.msrb.mxu1 %v2080_v40 }
  0x9c   : > { %646 = vmatpush.msrb.mxu3 %v407_v41  ;;  %684 = vmatpush.msrb.mxu0 %v429_v42  ;;  %v356_v42 = vld [vmem:[#allocation3 + $0xb8] sm:$0xff] }
  0x9d   : > { %575 = vmatmul.f32.gmra.mxu1 %v2063_v33  ;;  %763 = vmatpush.msrb.mxu2 %v2087_v43 }
  0x9e   : > { %647 = vmatpush.msrb.mxu3 %v400_v44  ;;  %685 = vmatpush.msrb.mxu0 %v422_v45 }
  0x9f   : > { %619 = vmatmul.f32.gmra.mxu2 %v1961_v55  ;;  %648 = vmatmul.f32.vlgmr.msrb.gmra.mxu3 %v1964_v56 }
  0xa0   : > { %686 = vmatpush.msrb.mxu0 %v415_v46  ;;  %1692 = vmatpush.msra.mxu3 %v1968_v58  ;;  %v424_v58 = vld [vmem:[%s1909_s10 + $0xd8] sm:$0xff] }
  0xa1   : > { %1683 = vmatpush.msrb.mxu1 %v2097_v47  ;;  %764 = vmatpush.msrb.mxu2 %v2100_v48 }
  0xa2   : > { %687 = vmatpush.msrb.mxu0 %v408_v49  ;;  %1693 = vmatpush.msra.mxu3 %v1975_v61  ;;  %v423_v61 = vld [vmem:[%s1909_s10 + $0xd0] sm:$0xff]  ;;  %v362_v49 = vld [vmem:[#allocation3 + $0xe8] sm:$0xff] }
  0xa3   : > { %1684 = vmatpush.msrb.mxu1 %v451_v50  ;;  %765 = vmatpush.msrb.mxu2 %v438_v51 }
  0xa4   : > { %688 = vmatpush.msrb.mxu0 %v401_v52  ;;  %1694 = vmatpush.msra.mxu3 %v1988_v3  ;;  %v333_v3 = vld [vmem:[#allocation3] sm:$0xff] }
  0xa5   : > { %578 = vmatmul.f32.gmra.mxu1 %v1961_v55  ;;  %689 = vmatmul.f32.vlgmr.msrb.gmra.mxu0 %v1964_v56  ;;  %v337_v52 = vld [vmem:[#allocation3 + $0x20] sm:$0xff] }
  0xa6   : > { %714 = vmatpush.msra.mxu0 %v1983_v1  ;;  %1685 = vmatpush.msrb.mxu1 %v444_v53  ;;  %v409_v1 = vld [vmem:[%s1909_s10 + $0x60] sm:$0xff] }
  0xa7   : > { %622 = vmatmul.f32.gmra.mxu2 %v1992_v4  ;;  %651 = vmatmul.f32.gmra.mxu3 %v1995_v5 }
  0xa8   : > { %715 = vmatpush.msra.mxu0 %v2002_v8  ;;  %1695 = vmatpush.msra.mxu3 %v2005_v9  ;;  %v361_v8 = vld [vmem:[#allocation3 + $0xe0] sm:$0xff]  ;;  %v335_v9 = vld [vmem:[#allocation3 + $0x10] sm:$0xff] }
  0xa9   : > { %766 = vmatpush.msrb.mxu2 %v431_v54  ;;  %1686 = vmatpush.msrb.mxu1 %v437_v57 }
  0xaa   : > { %716 = vmatpush.msra.mxu0 %v2012_v12  ;;  %1696 = vmatpush.msra.mxu3 %v2019_v15  ;;  %v368_v15 = vld [vmem:[#allocation3 + $0x118] sm:$0xff] }
  0xab   : > { %767 = vmatpush.msrb.mxu2 %v424_v58  ;;  %1687 = vmatpush.msrb.mxu1 %v430_v59 }
  0xac   : > { %717 = vmatpush.msra.mxu0 %v2036_v22  ;;  %1697 = vmatpush.msra.mxu3 %v2039_v23 }
  0xad   : > { %581 = vmatmul.f32.gmra.mxu1 %v1992_v4  ;;  %692 = vmatmul.f32.gmra.mxu0 %v1995_v5 }
  0xae   : > { %768 = vmatpush.msrb.mxu2 %v417_v60  ;;  %718 = vmatpush.msra.mxu0 %v2046_v26 }
  0xaf   : > { %625 = vmatmul.f32.gmra.mxu2 %v2026_v18  ;;  %654 = vmatmul.f32.gmra.mxu3 %v2029_v19 }
  0xb0   : > { %1688 = vmatpush.msrb.mxu1 %v423_v61  ;;  %1698 = vmatpush.msra.mxu3 %v2053_v29 }
  0xb1   : > { %769 = vmatpush.msrb.mxu2 %v410_v62  ;;  %719 = vmatpush.msra.mxu0 %v2070_v36 }
  0xb2   : > { %1689 = vmatpush.msrb.mxu1 %v416_v63  ;;  %1699 = vmatpush.msra.mxu3 %v2073_v37  ;;  %v354_v37 = vld [vmem:[#allocation3 + $0xa8] sm:$0xff] }
  0xb3   : > { %770 = vmatpush.msrb.mxu2 %v403_v0  ;;  %720 = vmatpush.msra.mxu0 %v2080_v40  ;;  %v355_v40 = vld [vmem:[#allocation3 + $0xb0] sm:$0xff] }
  0xb4   : > { %1690 = vmatpush.msrb.mxu1 %v409_v1  ;;  %1700 = vmatpush.msra.mxu3 %v2087_v43 }
  0xb5   : > { %584 = vmatmul.f32.gmra.mxu1 %v2026_v18  ;;  %695 = vmatmul.f32.gmra.mxu0 %v2029_v19 }
  0xb6   : > { %721 = vmatpush.msra.mxu0 %v2097_v47  ;;  %1691 = vmatpush.msrb.mxu1 %v402_v2 }
  0xb7   : > { %628 = vmatmul.f32.gmra.mxu2 %v2060_v32  ;;  %657 = vmatmul.f32.gmra.mxu3 %v2063_v33 }
  0xb8   : > { %1701 = vmatpush.msra.mxu3 %v2100_v48  ;;  %722 = vmatpush.msra.mxu0 %v451_v50  ;;  %v336_v50 = vld [vmem:[#allocation3 + $0x18] sm:$0xff] }
  0xba   : > { %1702 = vmatpush.msra.mxu3 %v438_v51  ;;  %723 = vmatpush.msra.mxu0 %v444_v53  ;;  %v363_v51 = vld [vmem:[#allocation3 + $0xf0] sm:$0xff] }
  0xbc   : > { %1703 = vmatpush.msra.mxu3 %v431_v54  ;;  %724 = vmatpush.msra.mxu0 %v437_v57 }
  0xbd   : > { %587 = vmatmul.f32.gmra.mxu1 %v2060_v32  ;;  %698 = vmatmul.f32.gmra.mxu0 %v2063_v33 }
  0xbe   : > { %1704 = vmatpush.msra.mxu3 %v424_v58  ;;  %725 = vmatpush.msra.mxu0 %v430_v59 }
  0xbf   : > { %660 = vmatmul.f32.gmra.mxu3 %v1961_v55  ;;  %771 = vmatmul.f32.vlgmr.msrb.gmra.mxu2 %v1964_v56 }
  0xc0   : > { %1705 = vmatpush.msra.mxu3 %v417_v60  ;;  %726 = vmatpush.msra.mxu0 %v423_v61 }
  0xc2   : > { %1706 = vmatpush.msra.mxu3 %v410_v62  ;;  %727 = vmatpush.msra.mxu0 %v416_v63  ;;  %v369_v63 = vld [vmem:[#allocation3 + $0x120] sm:$0xff] }
  0xc4   : > { %1707 = vmatpush.msra.mxu3 %v403_v0  ;;  %728 = vmatpush.msra.mxu0 %v409_v1  ;;  %v343_v0 = vld [vmem:[#allocation3 + $0x50] sm:$0xff]  ;;  %v370_v1 = vld [vmem:[#allocation3 + $0x128] sm:$0xff] }
  0xc5   : > { %701 = vmatmul.f32.gmra.mxu0 %v1961_v55  ;;  %736 = vmatmul.f32.vlgmr.msrb.gmra.mxu1 %v2029_v19 }
  0xc6   : > { %729 = vmatpush.msra.mxu0 %v402_v2  ;;  %v344_v2 = vld [vmem:[#allocation3 + $0x58] sm:$0xff] }
  0xc7   : > { %663 = vmatmul.f32.gmra.mxu3 %v1992_v4  ;;  %774 = vmatmul.f32.gmra.mxu2 %v1995_v5 }
  0xcd   : > { %704 = vmatmul.f32.gmra.mxu0 %v1992_v4  ;;  %739 = vmatmul.f32.gmra.mxu1 %v2063_v33 }
  0xcf   : > { %666 = vmatmul.f32.gmra.mxu3 %v2026_v18  ;;  %777 = vmatmul.f32.gmra.mxu2 %v2029_v19 }
  0xd5   : > { %707 = vmatmul.f32.gmra.mxu0 %v2026_v18  ;;  %742 = vmatmul.f32.gmra.mxu1 %v1961_v55 }
  0xd7   : > { %669 = vmatmul.f32.gmra.mxu3 %v2060_v32  ;;  %780 = vmatmul.f32.gmra.mxu2 %v2063_v33 }
  0xdd   : > { %710 = vmatmul.f32.gmra.mxu0 %v2060_v32  ;;  %745 = vmatmul.f32.gmra.mxu1 %v1992_v4 }
  0xdf   : > { %783 = vmatmul.f32.gmra.mxu2 %v1961_v55  ;;  %789 = vmatmul.f32.vlgmr.msra.gmra.mxu3 %v2026_v18 }
  0xe5   : > { %730 = vmatmul.f32.vlgmr.msra.gmra.mxu0 %v1964_v56  ;;  %748 = vmatmul.f32.gmra.mxu1 %v2026_v18  ;;  %v342_v18 = vld [vmem:[#allocation3 + $0x48] sm:$0xff] }
  0xe7   : > { %786 = vmatmul.f32.gmra.mxu2 %v1992_v4  ;;  %792 = vmatmul.f32.gmra.mxu3 %v2060_v32  ;;  %v340_v4 = vld [vmem:[#allocation3 + $0x38] sm:$0xff] }
  0xed   : > { %733 = vmatmul.f32.gmra.mxu0 %v1995_v5  ;;  %751 = vmatmul.f32.gmra.mxu1 %v2060_v32 }
 0x100   : > { %v526_v7 = vpop.f32.mrf.mxu0 }
 0x101   : > { %v796_v55 = vadd.f32 %v526_v7, %v333_v3  ;;  %v567_v10 = vpop.f32.mrf.mxu1 }
 0x102   : > { %v538_v11 = vpop.f32.mrf.mxu3  ;;  %v797_v12 = vadd.f32 %v567_v10, %v334_v6  ;;  %v608_v56 = vpop.f32.mrf.mxu2 }
 0x103   : > { %852 = vst [vmem:[#allocation3] sm:$0xff] %v796_v55  ;;  %v824_v13 = vadd.f32 %v538_v11, %v361_v8  ;;  %v798_v14 = vadd.f32 %v608_v56, %v335_v9  ;;  %v350_v56 = vld [vmem:[#allocation3 + $0x88] sm:$0xff] }
 0x104   : > { %853 = vst [vmem:[#allocation3 + $0x8] sm:$0xff] %v797_v12  ;;  %v376_v12 = vld [vmem:[#allocation3 + $0x158] sm:$0xff] }
 0x105   : > { %881 = vst [vmem:[#allocation3 + $0xe0] sm:$0xff] %v824_v13  ;;  %v377_v13 = vld [vmem:[#allocation3 + $0x160] sm:$0xff] }
 0x106   : > { %854 = vst [vmem:[#allocation3 + $0x10] sm:$0xff] %v798_v14  ;;  %v351_v14 = vld [vmem:[#allocation3 + $0x90] sm:$0xff] }
 0x108   : > { %v529_v5 = vpop.f32.mrf.mxu0 }
 0x109   : > { %v803_v17 = vadd.f32 %v529_v5, %v340_v4 }
 0x10a   : > { %v541_v19 = vpop.f32.mrf.mxu3  ;;  %v570_v20 = vpop.f32.mrf.mxu1 }
 0x10b   : > { %860 = vst [vmem:[#allocation3 + $0x38] sm:$0xff] %v803_v17  ;;  %v831_v21 = vadd.f32 %v541_v19, %v368_v15  ;;  %v804_v22 = vadd.f32 %v570_v20, %v341_v16  ;;  %v611_v23 = vpop.f32.mrf.mxu2 }
 0x10c   : > { %v805_v24 = vadd.f32 %v611_v23, %v342_v18  ;;  %v384_v23 = vld [vmem:[#allocation3 + $0x198] sm:$0xff] }
 0x10d   : > { %888 = vst [vmem:[#allocation3 + $0x118] sm:$0xff] %v831_v21  ;;  %v383_v21 = vld [vmem:[#allocation3 + $0x190] sm:$0xff] }
 0x10e   : > { %861 = vst [vmem:[#allocation3 + $0x40] sm:$0xff] %v804_v22  ;;  %v357_v22 = vld [vmem:[#allocation3 + $0xc0] sm:$0xff] }
 0x10f   : > { %862 = vst [vmem:[#allocation3 + $0x48] sm:$0xff] %v805_v24  ;;  %v358_v24 = vld [vmem:[#allocation3 + $0xc8] sm:$0xff] }
 0x110   : > { %v532_v26 = vpop.f32.mrf.mxu0 }
 0x111   : > { %v810_v29 = vadd.f32 %v532_v26, %v347_v25 }
 0x112   : > { %v544_v31 = vpop.f32.mrf.mxu3  ;;  %v573_v32 = vpop.f32.mrf.mxu1 }
 0x113   : > { %867 = vst [vmem:[#allocation3 + $0x70] sm:$0xff] %v810_v29  ;;  %v838_v33 = vadd.f32 %v544_v31, %v375_v27  ;;  %v811_v34 = vadd.f32 %v573_v32, %v348_v28  ;;  %v614_v35 = vpop.f32.mrf.mxu2 }
 0x114   : > { %v812_v36 = vadd.f32 %v614_v35, %v349_v30  ;;  %v365_v35 = vld [vmem:[#allocation3 + $0x100] sm:$0xff] }
 0x115   : > { %895 = vst [vmem:[#allocation3 + $0x150] sm:$0xff] %v838_v33  ;;  %v364_v33 = vld [vmem:[#allocation3 + $0xf8] sm:$0xff] }
 0x116   : > { %868 = vst [vmem:[#allocation3 + $0x78] sm:$0xff] %v811_v34  ;;  %v352_v34 = vld [vmem:[#allocation3 + $0x98] sm:$0xff] }
 0x117   : > { %869 = vst [vmem:[#allocation3 + $0x80] sm:$0xff] %v812_v36  ;;  %v339_v36 = vld [vmem:[#allocation3 + $0x30] sm:$0xff] }
 0x118   : > { %v535_v38 = vpop.f32.mrf.mxu0 }
 0x119   : > { %v817_v41 = vadd.f32 %v535_v38, %v354_v37 }
 0x11a   : > { %v547_v43 = vpop.f32.mrf.mxu3  ;;  %v576_v44 = vpop.f32.mrf.mxu1 }
 0x11b   : > { %874 = vst [vmem:[#allocation3 + $0xa8] sm:$0xff] %v817_v41  ;;  %v845_v45 = vadd.f32 %v547_v43, %v382_v39  ;;  %v818_v46 = vadd.f32 %v576_v44, %v355_v40  ;;  %v617_v47 = vpop.f32.mrf.mxu2 }
 0x11c   : > { %v819_v48 = vadd.f32 %v617_v47, %v356_v42  ;;  %v372_v47 = vld [vmem:[#allocation3 + $0x138] sm:$0xff] }
 0x11d   : > { %902 = vst [vmem:[#allocation3 + $0x188] sm:$0xff] %v845_v45  ;;  %v371_v45 = vld [vmem:[#allocation3 + $0x130] sm:$0xff] }
 0x11e   : > { %875 = vst [vmem:[#allocation3 + $0xb0] sm:$0xff] %v818_v46  ;;  %v359_v46 = vld [vmem:[#allocation3 + $0xd0] sm:$0xff] }
 0x11f   : > { %876 = vst [vmem:[#allocation3 + $0xb8] sm:$0xff] %v819_v48  ;;  %v346_v48 = vld [vmem:[#allocation3 + $0x68] sm:$0xff] }
 0x122   : > { %v579_v53 = vpop.f32.mrf.mxu1  ;;  %v649_v54 = vpop.f32.mrf.mxu3 }
 0x123   : > { %v825_v57 = vadd.f32 %v579_v53, %v362_v49  ;;  %v620_v58 = vpop.f32.mrf.mxu2  ;;  %v799_v59 = vadd.f32 %v649_v54, %v336_v50  ;;  %v690_v60 = vpop.f32.mrf.mxu0 }
 0x124   : > { %v826_v61 = vadd.f32 %v620_v58, %v363_v51  ;;  %v800_v62 = vadd.f32 %v690_v60, %v337_v52  ;;  %v366_v60 = vld [vmem:[#allocation3 + $0x108] sm:$0xff] }
 0x125   : > { %882 = vst [vmem:[#allocation3 + $0xe8] sm:$0xff] %v825_v57 }
 0x126   : > { %883 = vst [vmem:[#allocation3 + $0xf0] sm:$0xff] %v826_v61  ;;  %v379_v61 = vld [vmem:[#allocation3 + $0x170] sm:$0xff] }
 0x127   : > { %855 = vst [vmem:[#allocation3 + $0x18] sm:$0xff] %v799_v59  ;;  %v378_v59 = vld [vmem:[#allocation3 + $0x168] sm:$0xff] }
 0x128   : > { %856 = vst [vmem:[#allocation3 + $0x20] sm:$0xff] %v800_v62  ;;  %v353_v62 = vld [vmem:[#allocation3 + $0xa0] sm:$0xff] }
 0x12a   : > { %v582_v3 = vpop.f32.mrf.mxu1  ;;  %v652_v6 = vpop.f32.mrf.mxu3 }
 0x12b   : > { %v832_v7 = vadd.f32 %v582_v3, %v369_v63  ;;  %v623_v8 = vpop.f32.mrf.mxu2  ;;  %v806_v9 = vadd.f32 %v652_v6, %v343_v0  ;;  %v693_v55 = vpop.f32.mrf.mxu0 }
 0x12c   : > { %v833_v10 = vadd.f32 %v623_v8, %v370_v1  ;;  %v807_v11 = vadd.f32 %v693_v55, %v344_v2  ;;  %v373_v55 = vld [vmem:[#allocation3 + $0x140] sm:$0xff] }
 0x12d   : > { %889 = vst [vmem:[#allocation3 + $0x120] sm:$0xff] %v832_v7 }
 0x12e   : > { %890 = vst [vmem:[#allocation3 + $0x128] sm:$0xff] %v833_v10  ;;  %v386_v10 = vld [vmem:[#allocation3 + $0x1a8] sm:$0xff] }
 0x12f   : > { %863 = vst [vmem:[#allocation3 + $0x50] sm:$0xff] %v806_v9  ;;  %v385_v9 = vld [vmem:[#allocation3 + $0x1a0] sm:$0xff] }
 0x130   : > { %864 = vst [vmem:[#allocation3 + $0x58] sm:$0xff] %v807_v11  ;;  %v360_v11 = vld [vmem:[#allocation3 + $0xd8] sm:$0xff] }
 0x132   : > { %v585_v4 = vpop.f32.mrf.mxu1  ;;  %v655_v5 = vpop.f32.mrf.mxu3 }
 0x133   : > { %v839_v15 = vadd.f32 %v585_v4, %v376_v12  ;;  %v626_v16 = vpop.f32.mrf.mxu2  ;;  %v813_v17 = vadd.f32 %v655_v5, %v350_v56  ;;  %v696_v18 = vpop.f32.mrf.mxu0 }
 0x134   : > { %v840_v19 = vadd.f32 %v626_v16, %v377_v13  ;;  %v814_v20 = vadd.f32 %v696_v18, %v351_v14  ;;  %v338_v18 = vld [vmem:[#allocation3 + $0x28] sm:$0xff] }
 0x135   : > { %896 = vst [vmem:[#allocation3 + $0x158] sm:$0xff] %v839_v15 }
 0x136   : > { %897 = vst [vmem:[#allocation3 + $0x160] sm:$0xff] %v840_v19  ;;  %v367_v19 = vld [vmem:[#allocation3 + $0x110] sm:$0xff] }
 0x137   : > { %870 = vst [vmem:[#allocation3 + $0x88] sm:$0xff] %v813_v17  ;;  %v380_v17 = vld [vmem:[#allocation3 + $0x178] sm:$0xff] }
 0x138   : > { %871 = vst [vmem:[#allocation3 + $0x90] sm:$0xff] %v814_v20  ;;  %v381_v20 = vld [vmem:[#allocation3 + $0x180] sm:$0xff] }
 0x13a   : > { %v588_v25 = vpop.f32.mrf.mxu1  ;;  %v658_v26 = vpop.f32.mrf.mxu3 }
 0x13b   : > { %v846_v27 = vadd.f32 %v588_v25, %v383_v21  ;;  %v629_v28 = vpop.f32.mrf.mxu2  ;;  %v820_v29 = vadd.f32 %v658_v26, %v357_v22  ;;  %v699_v30 = vpop.f32.mrf.mxu0 }
 0x13c   : > { %v847_v31 = vadd.f32 %v629_v28, %v384_v23  ;;  %v821_v32 = vadd.f32 %v699_v30, %v358_v24  ;;  %v345_v30 = vld [vmem:[#allocation3 + $0x60] sm:$0xff] }
 0x13d   : > { %903 = vst [vmem:[#allocation3 + $0x190] sm:$0xff] %v846_v27 }
 0x13e   : > { %904 = vst [vmem:[#allocation3 + $0x198] sm:$0xff] %v847_v31  ;;  %v374_v31 = vld [vmem:[#allocation3 + $0x148] sm:$0xff] }
 0x13f   : > { %877 = vst [vmem:[#allocation3 + $0xc0] sm:$0xff] %v820_v29  ;;  %v387_v29 = vld [vmem:[#allocation3 + $0x1b0] sm:$0xff] }
 0x140   : > { %878 = vst [vmem:[#allocation3 + $0xc8] sm:$0xff] %v821_v32  ;;  %v388_v32 = vld [vmem:[#allocation3 + $0x1b8] sm:$0xff] }
 0x142   : > { %v661_v37 = vpop.f32.mrf.mxu3  ;;  %v737_v38 = vpop.f32.mrf.mxu1 }
 0x143   : > { %v827_v39 = vadd.f32 %v661_v37, %v364_v33  ;;  %v702_v40 = vpop.f32.mrf.mxu0  ;;  %v815_v41 = vadd.f32 %v737_v38, %v352_v34  ;;  %v772_v42 = vpop.f32.mrf.mxu2 }
 0x144   : > { %v828_v43 = vadd.f32 %v702_v40, %v365_v35  ;;  %v802_v44 = vadd.f32 %v772_v42, %v339_v36 }
 0x145   : > { %884 = vst [vmem:[#allocation3 + $0xf8] sm:$0xff] %v827_v39 }
 0x146   : > { %885 = vst [vmem:[#allocation3 + $0x100] sm:$0xff] %v828_v43 }
 0x147   : > { %872 = vst [vmem:[#allocation3 + $0x98] sm:$0xff] %v815_v41 }
 0x148   : > { %859 = vst.msk [vmem:[#allocation3 + $0x30] sm:$0xff] %vm858_vm1, %v802_v44 }
 0x14a   : > { %v664_v49 = vpop.f32.mrf.mxu3  ;;  %v740_v50 = vpop.f32.mrf.mxu1 }
 0x14b   : > { %v834_v51 = vadd.f32 %v664_v49, %v371_v45  ;;  %v705_v52 = vpop.f32.mrf.mxu0  ;;  %v822_v53 = vadd.f32 %v740_v50, %v359_v46  ;;  %v775_v54 = vpop.f32.mrf.mxu2 }
 0x14c   : > { %v835_v57 = vadd.f32 %v705_v52, %v372_v47  ;;  %v809_v58 = vadd.f32 %v775_v54, %v346_v48 }
 0x14d   : > { %891 = vst [vmem:[#allocation3 + $0x130] sm:$0xff] %v834_v51 }
 0x14e   : > { %892 = vst [vmem:[#allocation3 + $0x138] sm:$0xff] %v835_v57 }
 0x14f   : > { %879 = vst [vmem:[#allocation3 + $0xd0] sm:$0xff] %v822_v53 }
 0x150   : > { %866 = vst.msk [vmem:[#allocation3 + $0x68] sm:$0xff] %vm858_vm1, %v809_v58 }
 0x152   : > { %v667_v63 = vpop.f32.mrf.mxu3  ;;  %v743_v0 = vpop.f32.mrf.mxu1 }
 0x153   : > { %v841_v1 = vadd.f32 %v667_v63, %v378_v59  ;;  %v708_v2 = vpop.f32.mrf.mxu0  ;;  %v829_v3 = vadd.f32 %v743_v0, %v366_v60  ;;  %v778_v6 = vpop.f32.mrf.mxu2 }
 0x154   : > { %v842_v7 = vadd.f32 %v708_v2, %v379_v61  ;;  %v816_v8 = vadd.f32 %v778_v6, %v353_v62 }
 0x155   : > { %898 = vst [vmem:[#allocation3 + $0x168] sm:$0xff] %v841_v1 }
 0x156   : > { %899 = vst [vmem:[#allocation3 + $0x170] sm:$0xff] %v842_v7 }
 0x157   : > { %886 = vst [vmem:[#allocation3 + $0x108] sm:$0xff] %v829_v3 }
 0x158   : > { %873 = vst.msk [vmem:[#allocation3 + $0xa0] sm:$0xff] %vm858_vm1, %v816_v8 }
 0x15a   : > { %v670_v12 = vpop.f32.mrf.mxu3  ;;  %v746_v56 = vpop.f32.mrf.mxu1 }
 0x15b   : > { %v848_v13 = vadd.f32 %v670_v12, %v385_v9  ;;  %v711_v14 = vpop.f32.mrf.mxu0  ;;  %v836_v4 = vadd.f32 %v746_v56, %v373_v55  ;;  %v781_v5 = vpop.f32.mrf.mxu2 }
 0x15c   : > { %v849_v15 = vadd.f32 %v711_v14, %v386_v10  ;;  %v823_v16 = vadd.f32 %v781_v5, %v360_v11 }
 0x15d   : > { %905 = vst [vmem:[#allocation3 + $0x1a0] sm:$0xff] %v848_v13 }
 0x15e   : > { %906 = vst [vmem:[#allocation3 + $0x1a8] sm:$0xff] %v849_v15 }
 0x15f   : > { %893 = vst [vmem:[#allocation3 + $0x140] sm:$0xff] %v836_v4 }
 0x160   : > { %880 = vst.msk [vmem:[#allocation3 + $0xd8] sm:$0xff] %vm858_vm1, %v823_v16 }
 0x162   : > { %v749_v21 = vpop.f32.mrf.mxu1  ;;  %v790_v22 = vpop.f32.mrf.mxu3 }
 0x163   : > { %v731_v23 = vpop.f32.mrf.mxu0  ;;  %v843_v24 = vadd.f32 %v749_v21, %v380_v17  ;;  %v784_v25 = vpop.f32.mrf.mxu2  ;;  %v844_v28 = vadd.f32 %v790_v22, %v381_v20 }
 0x164   : > { %v801_v26 = vadd.f32 %v731_v23, %v338_v18  ;;  %v830_v27 = vadd.f32 %v784_v25, %v367_v19 }
 0x165   : > { %900 = vst [vmem:[#allocation3 + $0x178] sm:$0xff] %v843_v24 }
 0x166   : > { %857 = vst [vmem:[#allocation3 + $0x28] sm:$0xff] %v801_v26 }
 0x167   : > { %887 = vst.msk [vmem:[#allocation3 + $0x110] sm:$0xff] %vm858_vm1, %v830_v27 }
 0x168   : > { %901 = vst.msk [vmem:[#allocation3 + $0x180] sm:$0xff] %vm858_vm1, %v844_v28 }
 0x16a   : > { %v752_v33 = vpop.f32.mrf.mxu1  ;;  %v793_v34 = vpop.f32.mrf.mxu3 }
 0x16b   : > { %v734_v35 = vpop.f32.mrf.mxu0  ;;  %v850_v36 = vadd.f32 %v752_v33, %v387_v29  ;;  %v787_v37 = vpop.f32.mrf.mxu2  ;;  %v851_v40 = vadd.f32 %v793_v34, %v388_v32 }
 0x16c   : > { %v808_v38 = vadd.f32 %v734_v35, %v345_v30  ;;  %v837_v39 = vadd.f32 %v787_v37, %v374_v31  ;;  %912 = sbr.rel (%p1655_p10) target bundleno = 731 (0x2db), region = 82 }
 0x16d   : > { %907 = vst [vmem:[#allocation3 + $0x1b0] sm:$0xff] %v850_v36 }
 0x16e   : > { %865 = vst [vmem:[#allocation3 + $0x60] sm:$0xff] %v808_v38 }
 0x16f   : > { %894 = vst.msk [vmem:[#allocation3 + $0x148] sm:$0xff] %vm858_vm1, %v837_v39 }
 0x170   : > { %908 = vst.msk [vmem:[#allocation3 + $0x1b8] sm:$0xff] %vm858_vm1, %v851_v40 }
 0x171   : > { %v2187_v41 = vld [vmem:[#allocation3 + $0xe0] sm:$0xff]  ;;  %v2189_v42 = vld [vmem:[#allocation3 + $0xe8] sm:$0xff]  ;;  %v2191_v43 = vld [vmem:[#allocation3 + $0xf0] sm:$0xff] }
 0x172   : > { %v2193_v44 = vld [vmem:[#allocation3 + $0xf8] sm:$0xff]  ;;  %v1005_v45 = vadd.f32 %v2189_v42, %v2187_v41  ;;  %v2197_v46 = vld [vmem:[#allocation3 + $0x110] sm:$0xff]  ;;  %v2203_v49 = vld [vmem:[#allocation3 + $0x100] sm:$0xff] }
 0x173   : > { %v2199_v47 = vld [vmem:[#allocation3 + $0x70] sm:$0xff]  ;;  %v2201_v48 = vld [vmem:[#allocation3 + $0x78] sm:$0xff]  ;;  %v2206_v51 = vld [vmem:[#allocation3 + $0x80] sm:$0xff]  ;;  %v1010_v54 = vsel %vm858_vm1, %v2197_v46, 0.0 }
 0x174   : > { %2747 = vst [vmem:[#allocation6_spill] sm:$0xff] %v2201_v48  ;;  %v1006_v50 = vadd.f32 %v1005_v45, %v2191_v43  ;;  %v987_v52 = vadd.f32 %v2201_v48, %v2199_v47  ;;  %v2210_v53 = vld [vmem:[#allocation3 + $0x108] sm:$0xff]  ;;  %v913_v58 = vld [vmem:[#allocation3] sm:$0xff]  ;;  %v915_v63 = vld [vmem:[#allocation3 + $0x10] sm:$0xff]  ;;  %v2222_v1 = vmul.f32 %v2199_v47, %v2199_v47  ;;  %v2228_v9 = vmul.f32 %v2201_v48, %v2201_v48 }
 0x175   : > { %2748 = vst [vmem:[#allocation7_spill] sm:$0xff] %v2206_v51  ;;  %v2214_v57 = vld [vmem:[#allocation3 + $0x88] sm:$0xff]  ;;  %v2217_v60 = vld [vmem:[#allocation3 + $0xa0] sm:$0xff]  ;;  %v1049_v0 = vmul.f32 %v913_v58, %v913_v58  ;;  %v2224_v2 = vld [vmem:[#allocation3 + $0x90] sm:$0xff]  ;;  %v2232_v55 = vmul.f32 %v2206_v51, %v2206_v51  ;;  %v1051_v14 = vmul.f32 %v915_v63, %v915_v63 }
 0x176   : > { %2749 = vst [vmem:[#allocation8_spill] sm:$0xff] %v2214_v57  ;;  %v1007_v59 = vadd.f32 %v1006_v50, %v2193_v44  ;;  %v988_v61 = vadd.f32 %v987_v52, %v2206_v51  ;;  %v914_v62 = vld [vmem:[#allocation3 + $0x8] sm:$0xff]  ;;  %v916_v3 = vld [vmem:[#allocation3 + $0x18] sm:$0xff]  ;;  %v919_v6 = vld [vmem:[#allocation3 + $0x30] sm:$0xff]  ;;  %v2244_v4 = vmul.f32 %v2214_v57, %v2214_v57  ;;  %v992_v15 = vsel %vm858_vm1, %v2217_v60, 0.0 }
 0x177   : > { %2750 = vst [vmem:[#allocation9_spill] sm:$0xff] %v2217_v60  ;;  %v969_v7 = vadd.f32 %v914_v62, %v913_v58  ;;  %v1050_v8 = vmul.f32 %v914_v62, %v914_v62  ;;  %v2236_v12 = vld [vmem:[#allocation3 + $0x118] sm:$0xff]  ;;  %v2238_v56 = vld [vmem:[#allocation3 + $0x120] sm:$0xff]  ;;  %v2240_v13 = vld [vmem:[#allocation3 + $0x128] sm:$0xff]  ;;  %v2256_v19 = vmul.f32 %v2224_v2, %v2224_v2  ;;  %v1052_v25 = vmul.f32 %v916_v3, %v916_v3 }
 0x178   : > { %2751 = vst [vmem:[#allocation10_spill] sm:$0xff] %v2224_v2  ;;  %v1008_v10 = vadd.f32 %v1007_v59, %v2203_v49  ;;  %v989_v11 = vadd.f32 %v988_v61, %v2214_v57  ;;  %v2246_v5 = vld [vmem:[#allocation3 + $0x98] sm:$0xff]  ;;  %v2250_v16 = vld [vmem:[#allocation3 + $0x20] sm:$0xff]  ;;  %v1014_v18 = vadd.f32 %v2238_v56, %v2236_v12  ;;  %v2260_v22 = vld [vmem:[#allocation3 + $0x130] sm:$0xff]  ;;  %v974_v29 = vsel %vm858_vm1, %v919_v6, 0.0 }
 0x179   : > { %2752 = vst [vmem:[#allocation11_spill] sm:$0xff] %v2246_v5  ;;  %v970_v17 = vadd.f32 %v969_v7, %v915_v63  ;;  %v2262_v23 = vld [vmem:[#allocation3 + $0xa8] sm:$0xff]  ;;  %v2264_v24 = vld [vmem:[#allocation3 + $0xb0] sm:$0xff]  ;;  %v1105_v26 = vadd.f32 %v1050_v8, %v1049_v0  ;;  %v2269_v30 = vld [vmem:[#allocation3 + $0x138] sm:$0xff]  ;;  %v1053_v39 = vmul.f32 %v2250_v16, %v2250_v16  ;;  %v1055_v61 = vmul.f32 %v919_v6, %v919_v6 }
 0x17a   : > { %2753 = vst [vmem:[#allocation12_spill] sm:$0xff] %v2250_v16  ;;  %v1009_v20 = vadd.f32 %v1008_v10, %v2210_v53  ;;  %v990_v21 = vadd.f32 %v989_v11, %v2224_v2  ;;  %v2266_v27 = vld [vmem:[#allocation3 + $0x28] sm:$0xff]  ;;  %v1015_v31 = vadd.f32 %v1014_v18, %v2240_v13  ;;  %v2272_v32 = vld [vmem:[#allocation3 + $0xb8] sm:$0xff]  ;;  %v996_v33 = vadd.f32 %v2264_v24, %v2262_v23  ;;  %v2279_v37 = vld [vmem:[#allocation3 + $0xc0] sm:$0xff] }
 0x17b   : > { %2754 = vst [vmem:[#allocation13_spill] sm:$0xff] %v2266_v27  ;;  %v971_v28 = vadd.f32 %v970_v17, %v916_v3  ;;  %v2277_v36 = vld [vmem:[#allocation3 + $0x148] sm:$0xff]  ;;  %v2281_v38 = vld [vmem:[#allocation3 + $0x38] sm:$0xff]  ;;  %v1106_v40 = vadd.f32 %v1105_v26, %v1051_v14  ;;  %v2286_v50 = vld [vmem:[#allocation3 + $0x140] sm:$0xff]  ;;  %v1054_v8 = vmul.f32 %v2266_v27, %v2266_v27 }
 0x17c   : > { %v1011_v34 = vadd.f32 %v1010_v54, %v1009_v20  ;;  %v991_v35 = vadd.f32 %v990_v21, %v2246_v5  ;;  %v1016_v52 = vadd.f32 %v1015_v31, %v2260_v22  ;;  %v997_v54 = vadd.f32 %v996_v33, %v2272_v32  ;;  %v2290_v58 = vld [vmem:[#allocation3 + $0x40] sm:$0xff]  ;;  %v2292_v59 = vld [vmem:[#allocation3 + $0x48] sm:$0xff]  ;;  %v2296_v0 = vld [vmem:[#allocation3 + $0xd8] sm:$0xff] }
 0x17d   : > { %v972_v45 = vadd.f32 %v971_v28, %v2250_v16  ;;  %v2294_v63 = vld [vmem:[#allocation3 + $0xc8] sm:$0xff]  ;;  %v2298_v3 = vld [vmem:[#allocation3 + $0x50] sm:$0xff]  ;;  %v978_v7 = vadd.f32 %v2290_v58, %v2281_v38  ;;  %v1107_v10 = vadd.f32 %v1106_v40, %v1052_v25  ;;  %v1019_v6 = vsel %vm858_vm1, %v2277_v36, 0.0  ;;  %v2313_v20 = vld [vmem:[#allocation3 + $0x198] sm:$0xff] }
 0x17e   : > { %1012 = vadd.xlane.f32.xlu2 %v1011_v34  ;;  %v993_v62 = vadd.f32 %v992_v15, %v991_v35  ;;  %v1017_v14 = vadd.f32 %v1016_v52, %v2269_v30  ;;  %v998_v15 = vadd.f32 %v997_v54, %v2279_v37  ;;  %v2309_v17 = vld [vmem:[#allocation3 + $0x188] sm:$0xff]  ;;  %v2311_v18 = vld [vmem:[#allocation3 + $0x190] sm:$0xff]  ;;  %v2317_v26 = vld [vmem:[#allocation3 + $0x58] sm:$0xff]  ;;  %v1123_v34 = vadd.f32 %v2228_v9, %v2222_v1 }
 0x17f   : > { %v973_v11 = vadd.f32 %v972_v45, %v2266_v27  ;;  %v2315_v21 = vld [vmem:[#allocation3 + $0xd0] sm:$0xff]  ;;  %v2319_v25 = vld [vmem:[#allocation3 + $0x68] sm:$0xff]  ;;  %v979_v28 = vadd.f32 %v978_v7, %v2292_v59  ;;  %v1032_v31 = vadd.f32 %v2311_v18, %v2309_v17  ;;  %v1108_v33 = vadd.f32 %v1107_v10, %v1053_v39  ;;  %v2328_v52 = vld [vmem:[#allocation3 + $0x1a0] sm:$0xff] }
 0x180   : > { %994 = vadd.xlane.f32.xlu1 %v993_v62  ;;  %v1018_v40 = vadd.f32 %v1017_v14, %v2286_v50  ;;  %v999_v45 = vadd.f32 %v998_v15, %v2294_v63  ;;  %v1110_v54 = vsel %vm858_vm1, %v1055_v61, 0.0  ;;  %v2331_v62 = vld [vmem:[#allocation3 + $0x150] sm:$0xff]  ;;  %v2333_v27 = vld [vmem:[#allocation3 + $0x158] sm:$0xff]  ;;  %v1001_v7 = vsel %vm858_vm1, %v2296_v0, 0.0  ;;  %v2339_v9 = vld [vmem:[#allocation3 + $0x160] sm:$0xff] }
 0x181   : > { %v975_v35 = vadd.f32 %v974_v29, %v973_v11  ;;  %v980_v39 = vadd.f32 %v979_v28, %v2298_v3  ;;  %v1033_v1 = vadd.f32 %v1032_v31, %v2313_v20  ;;  %v1069_v29 = vmul.f32 %v2217_v60, %v2217_v60  ;;  %v2344_v11 = vld [vmem:[#allocation3 + $0x60] sm:$0xff]  ;;  %v2346_v14 = vld [vmem:[#allocation3 + $0x1a8] sm:$0xff]  ;;  %v2354_v2 = vld [vmem:[#allocation3 + $0x1b8] sm:$0xff] }
 0x182   : > { %v1020_v10 = vadd.f32 %v1019_v6, %v1018_v40  ;;  %v1000_v61 = vadd.f32 %v999_v45, %v2315_v21  ;;  %v1023_v15 = vadd.f32 %v2333_v27, %v2331_v62  ;;  %v1124_v28 = vadd.f32 %v1123_v34, %v2232_v55  ;;  %v2357_v40 = vld [vmem:[#allocation3 + $0x168] sm:$0xff]  ;;  %v2359_v60 = vld [vmem:[#allocation3 + $0x1b0] sm:$0xff] }
 0x183   : > { %976 = vadd.xlane.f32.xlu0 %v975_v35  ;;  %v981_v31 = vadd.f32 %v980_v39, %v2317_v26  ;;  %v983_v16 = vsel %vm858_vm1, %v2319_v25, 0.0  ;;  %v1034_v6 = vadd.f32 %v1033_v1, %v2328_v52  ;;  %v1109_v35 = vadd.f32 %v1108_v33, %v1054_v8  ;;  %v2367_v48 = vld [vmem:[#allocation3 + $0x170] sm:$0xff] }
 0x184   : > { %v1002_v45 = vadd.f32 %v1001_v7, %v1000_v61  ;;  %v1024_v57 = vadd.f32 %v1023_v15, %v2339_v9  ;;  %v1125_v51 = vadd.f32 %v1124_v28, %v2244_v4  ;;  %v1070_v55 = vmul.f32 %v2262_v23, %v2262_v23  ;;  %2755 = vst [vmem:[#allocation14_spill] sm:$0xff] %v2367_v48  ;;  %v2375_v4 = vld [vmem:[#allocation3 + $0x180] sm:$0xff] }
 0x185   : > { %v982_v34 = vadd.f32 %v981_v31, %v2344_v11  ;;  %v1035_v39 = vadd.f32 %v1034_v6, %v2346_v14  ;;  %v1068_v8 = vmul.f32 %v2246_v5, %v2246_v5  ;;  %v1071_v33 = vmul.f32 %v2264_v24, %v2264_v24  ;;  %2756 = vst [vmem:[#allocation15_spill] sm:$0xff] %v2375_v4  ;;  %v2382_v31 = vld [vmem:[#allocation3 + $0x178] sm:$0xff] }
 0x186   : > { %1021 = vadd.xlane.f32.xlu2 %v1020_v10  ;;  %v1037_v7 = vsel %vm858_vm1, %v2354_v2, 0.0  ;;  %v1025_v23 = vadd.f32 %v1024_v57, %v2357_v40  ;;  %v1128_v1 = vsel %vm858_vm1, %v1069_v29, 0.0  ;;  %v1072_v10 = vmul.f32 %v2272_v32, %v2272_v32  ;;  %2757 = vst [vmem:[#allocation16_spill] sm:$0xff] %v2382_v31 }
 0x187   : > { %v984_v61 = vadd.f32 %v983_v16, %v982_v34  ;;  %v1036_v15 = vadd.f32 %v1035_v39, %v2359_v60  ;;  %v1111_v28 = vadd.f32 %v1110_v54, %v1109_v35  ;;  %v1126_v24 = vadd.f32 %v1125_v51, %v2256_v19 }
 0x188   : > { %1003 = vadd.xlane.f32.xlu1 %v1002_v45  ;;  %v1026_v6 = vadd.f32 %v1025_v23, %v2367_v48  ;;  %v1073_v5 = vmul.f32 %v2279_v37, %v2279_v37  ;;  %v1132_v57 = vadd.f32 %v1071_v33, %v1070_v55  ;;  %v1056_v29 = vmul.f32 %v2281_v38, %v2281_v38 }
 0x189   : > { %v1028_v32 = vsel %vm858_vm1, %v2375_v4, 0.0  ;;  %v1076_v16 = vmul.f32 %v2296_v0, %v2296_v0  ;;  %v1057_v54 = vmul.f32 %v2290_v58, %v2290_v58  ;;  %v1058_v51 = vmul.f32 %v2292_v59, %v2292_v59 }
 0x18a   : > { %v1027_v19 = vadd.f32 %v1026_v6, %v2382_v31  ;;  %v1074_v37 = vmul.f32 %v2294_v63, %v2294_v63  ;;  %v1075_v35 = vmul.f32 %v2315_v21, %v2315_v21  ;;  %v1133_v45 = vadd.f32 %v1132_v57, %v1072_v10 }
 0x18b   : > { %985 = vadd.xlane.f32.xlu0 %v984_v61  ;;  %v1038_v55 = vadd.f32 %v1037_v7, %v1036_v15  ;;  %v1127_v34 = vadd.f32 %v1126_v24, %v1068_v8  ;;  %v1059_v0 = vmul.f32 %v2298_v3, %v2298_v3  ;;  %v1114_v39 = vadd.f32 %v1057_v54, %v1056_v29 }
 0x18c   : > { %v1134_v33 = vadd.f32 %v1133_v45, %v1073_v5  ;;  %v1062_v23 = vmul.f32 %v2319_v25, %v2319_v25  ;;  %v1084_v61 = vmul.f32 %v2236_v12, %v2236_v12  ;;  %v1085_v63 = vmul.f32 %v2238_v56, %v2238_v56 }
 0x18d   : > { %v1137_v6 = vsel %vm858_vm1, %v1076_v16, 0.0  ;;  %v1060_v8 = vmul.f32 %v2317_v26, %v2317_v26  ;;  %v1115_v7 = vadd.f32 %v1114_v39, %v1058_v51  ;;  %v1086_v10 = vmul.f32 %v2240_v13, %v2240_v13 }
 0x18e   : > { %1112 = vadd.xlane.f32.xlu2 %v1111_v28  ;;  %v1029_v5 = vadd.f32 %v1028_v32, %v1027_v19  ;;  %v1135_v15 = vadd.f32 %v1134_v33, %v1074_v37  ;;  %v1061_v24 = vmul.f32 %v2344_v11, %v2344_v11  ;;  %v1087_v57 = vmul.f32 %v2260_v22, %v2260_v22 }
 0x18f   : > { %v1116_v29 = vadd.f32 %v1115_v7, %v1059_v0  ;;  %v1150_v28 = vadd.f32 %v1085_v63, %v1084_v61  ;;  %v1091_v16 = vmul.f32 %v2331_v62, %v2331_v62  ;;  %v1092_v54 = vmul.f32 %v2333_v27, %v2333_v27 }
 0x190   : > { %1039 = vadd.xlane.f32.xlu1 %v1038_v55  ;;  %v1129_v51 = vadd.f32 %v1128_v1, %v1127_v34  ;;  %v1136_v45 = vadd.f32 %v1135_v15, %v1075_v35  ;;  %v1119_v32 = vsel %vm858_vm1, %v1062_v23, 0.0  ;;  %v1093_v19 = vmul.f32 %v2339_v9, %v2339_v9 }
 0x191   : > { %v1117_v37 = vadd.f32 %v1116_v29, %v1060_v8  ;;  %v1088_v39 = vmul.f32 %v2269_v30, %v2269_v30  ;;  %v1089_v55 = vmul.f32 %v2286_v50, %v2286_v50  ;;  %v1151_v0 = vadd.f32 %v1150_v28, %v1086_v10 }
 0x192   : > { %v1138_v33 = vadd.f32 %v1137_v6, %v1136_v45  ;;  %v1094_v61 = vmul.f32 %v2357_v40, %v2357_v40  ;;  %v1159_v1 = vadd.f32 %v1092_v54, %v1091_v16  ;;  %v1077_v35 = vmul.f32 %v2187_v41, %v2187_v41 }
 0x193   : > { %1030 = vadd.xlane.f32.xlu0 %v1029_v5  ;;  %v1118_v34 = vadd.f32 %v1117_v37, %v1061_v24  ;;  %v1090_v23 = vmul.f32 %v2277_v36, %v2277_v36  ;;  %v1152_v63 = vadd.f32 %v1151_v0, %v1087_v57  ;;  %v1078_v8 = vmul.f32 %v2189_v42, %v2189_v42 }
 0x194   : > { %v1095_v7 = vmul.f32 %v2367_v48, %v2367_v48  ;;  %v1096_v6 = vmul.f32 %v2382_v31, %v2382_v31  ;;  %v1160_v10 = vadd.f32 %v1159_v1, %v1093_v19  ;;  %v1079_v5 = vmul.f32 %v2191_v43, %v2191_v43 }
 0x195   : > { %v1120_v15 = vadd.f32 %v1119_v32, %v1118_v34  ;;  %v1153_v24 = vadd.f32 %v1152_v63, %v1088_v39  ;;  %v1097_v29 = vmul.f32 %v2375_v4, %v2375_v4  ;;  %v1080_v57 = vmul.f32 %v2193_v44, %v2193_v44 }
 0x196   : > { %1139 = vadd.xlane.f32.xlu2 %v1138_v33  ;;  %v1161_v42 = vadd.f32 %v1160_v10, %v1094_v61  ;;  %v1141_v28 = vadd.f32 %v1078_v8, %v1077_v35  ;;  %v1098_v16 = vmul.f32 %v2309_v17, %v2309_v17  ;;  %v1099_v54 = vmul.f32 %v2311_v18, %v2311_v18 }
 0x197   : > { %v1154_v45 = vadd.f32 %v1153_v24, %v1089_v55  ;;  %v1100_v43 = vmul.f32 %v2313_v20, %v2313_v20  ;;  %v1155_v32 = vsel %vm858_vm1, %v1090_v23, 0.0  ;;  %v1081_v37 = vmul.f32 %v2203_v49, %v2203_v49 }
 0x198   : > { %1130 = vadd.xlane.f32.xlu1 %v1129_v51  ;;  %v1162_v19 = vadd.f32 %v1161_v42, %v1095_v7  ;;  %v1142_v44 = vadd.f32 %v1141_v28, %v1079_v5  ;;  %v1164_v39 = vsel %vm858_vm1, %v1097_v29, 0.0  ;;  %v1083_v0 = vmul.f32 %v2197_v46, %v2197_v46 }
 0x199   : > { %v1101_v33 = vmul.f32 %v2328_v52, %v2328_v52  ;;  %v1168_v51 = vadd.f32 %v1099_v54, %v1098_v16  ;;  %v1082_v61 = vmul.f32 %v2210_v53, %v2210_v53  ;;  %v1156_v35 = vadd.f32 %v1155_v32, %v1154_v45 }
 0x19a   : > { %v1163_v55 = vadd.f32 %v1162_v19, %v1096_v6  ;;  %v1143_v1 = vadd.f32 %v1142_v44, %v1080_v57  ;;  %v1102_v49 = vmul.f32 %v2346_v14, %v2346_v14  ;;  %v1146_v8 = vsel %vm858_vm1, %v1083_v0, 0.0 }
 0x19b   : > { %1121 = vadd.xlane.f32.xlu0 %v1120_v15  ;;  %v1169_v34 = vadd.f32 %v1168_v51, %v1100_v43  ;;  %v1103_v10 = vmul.f32 %v2359_v60, %v2359_v60  ;;  %v1104_v53 = vmul.f32 %v2354_v2, %v2354_v2  ;;  %v1837_v19 = vmov 0  }
 0x19c   : > { %v1165_v23 = vadd.f32 %v1164_v39, %v1163_v55  ;;  %v1144_v63 = vadd.f32 %v1143_v1, %v1081_v37  ;;  %1744 = vset.pattern.permute.xlu1 %v1837_v19  ;;  %1746 = vset.pattern.permute.xlu0 %v1837_v19 }
 0x19d   : > { %v1170_v46 = vadd.f32 %v1169_v34, %v1101_v33  ;;  %v1173_v24 = vsel %vm858_vm1, %v1104_v53, 0.0  ;;  %1745 = vset.pattern.permute.xlu2 %v1837_v19 }
 0x19e   : > { %1166 = vadd.xlane.f32.xlu2 %v1165_v23  ;;  %v1145_v7 = vadd.f32 %v1144_v63, %v1082_v61 }
 0x19f   : > { %v1171_v6 = vadd.f32 %v1170_v46, %v1102_v49 }
 0x1a0   : > { %1157 = vadd.xlane.f32.xlu1 %v1156_v35  ;;  %v1147_v5 = vadd.f32 %v1146_v8, %v1145_v7 }
 0x1a1   : > { %v1172_v15 = vadd.f32 %v1171_v6, %v1103_v10 }
 0x1a3   : > { %1148 = vadd.xlane.f32.xlu0 %v1147_v5  ;;  %v1174_v29 = vadd.f32 %v1173_v24, %v1172_v15 }
 0x1ab   : > { %1175 = vadd.xlane.f32.xlu0 %v1174_v29 }
 0x1f1   : > { %v1013_v57 = vpop.xlane.xlu2 %1012 }
 0x1f3   : > { %v995_v42 = vpop.xlane.xlu1 %994 }
 0x1f4   : > { %v2479_v61 = vmul.f32 0.0012755102, %v995_v42 }
 0x1f6   : > { %v977_v28 = vpop.xlane.xlu0 %976  ;;  %v1187_v63 = vmul.f32 %v2479_v61, %v2479_v61 }
 0x1f7   : > { %v2473_v45 = vmul.f32 0.0012755102, %v977_v28 }
 0x1f9   : > { %v1022_v16 = vpop.xlane.xlu2 %1021  ;;  %v1185_v37 = vmul.f32 %v2473_v45, %v2473_v45 }
 0x1fa   : > { %v2493_v42 = vmul.f32 0.0012755102, %v1022_v16 }
 0x1fb   : > { %v1004_v54 = vpop.xlane.xlu1 %1003 }
 0x1fc   : > { %v2477_v0 = vmul.f32 0.0012755102, %v1004_v54  ;;  %v1190_v16 = vmul.f32 %v2493_v42, %v2493_v42 }
 0x1fe   : > { %v986_v43 = vpop.xlane.xlu0 %985  ;;  %v1188_v1 = vmul.f32 %v2477_v0, %v2477_v0 }
 0x1ff   : > { %v2483_v34 = vmul.f32 0.0012755102, %v986_v43 }
 0x201   : > { %v1113_v32 = vpop.xlane.xlu2 %1112  ;;  %v1186_v5 = vmul.f32 %v2483_v34, %v2483_v34 }
 0x202   : > { %v1177_v44 = vmul.f32 0.0012755102, %v1113_v32 }
 0x203   : > { %v1040_v39 = vpop.xlane.xlu1 %1039 }
 0x204   : > { %v1193_v33 = vsub.f32 %v1177_v44, %v1185_v37 }
 0x206   : > { %v1201_v51 = vadd.f32 1e-05, %v1193_v33  ;;  %v1031_v55 = vpop.xlane.xlu0 %1030 }
 0x207   : > { %v2491_v24 = vmul.f32 0.0012755102, %v1031_v55 }
 0x208   : > { %1747 = vrsqrt.f32 %v1201_v51  ;;  %vm1215_vm3 = vweird.f32 %v1201_v51 }
 0x209   : > { %v1140_v35 = vpop.xlane.xlu2 %1139  ;;  %v1191_v37 = vmul.f32 %v2491_v24, %v2491_v24 }
 0x20a   : > { %v1180_v49 = vmul.f32 0.0012755102, %v1140_v35 }
 0x20b   : > { %v1131_v23 = vpop.xlane.xlu1 %1130 }
 0x20c   : > { %v1179_v8 = vmul.f32 0.0012755102, %v1131_v23  ;;  %v1196_v46 = vsub.f32 %v1180_v49, %v1188_v1  ;;  %v2503_v1 = vmul.f32 0.0012755102, %v1013_v57 }
 0x20e   : > { %v1748_v7 = vpop.eup %1747  ;;  %v1195_v10 = vsub.f32 %v1179_v8, %v1187_v63  ;;  %v2487_v53 = vadd.f32 1e-05, %v1196_v46  ;;  %v1122_v6 = vpop.xlane.xlu0 %1121  ;;  %v1189_v57 = vmul.f32 %v2503_v1, %v2503_v1 }
 0x20f   : > { %v1210_v15 = vmul.f32 %v1748_v7, %v1201_v51  ;;  %v1178_v29 = vmul.f32 0.0012755102, %v1122_v6  ;;  %vm1216_vm2 = vweird.f32 %v1748_v7  ;;  %v2524_v51 = vmul.f32 0.0012755102, %v1040_v39 }
 0x210   : > { %v2495_v28 = vadd.f32 1e-05, %v1195_v10  ;;  %1749 = vrsqrt.f32 %v2487_v53  ;;  %vm1217_vm4 = vmor %vm1215_vm3, %vm1216_vm2  ;;  %vm1245_vm12 = vweird.f32 %v2487_v53 }
 0x211   : > { %v1211_v54 = vmul.f32 %v1748_v7, %v1210_v15  ;;  %v1194_v43 = vsub.f32 %v1178_v29, %v1186_v5  ;;  %v1167_v32 = vpop.xlane.xlu2 %1166  ;;  %v1192_v39 = vmul.f32 %v2524_v51, %v2524_v51 }
 0x212   : > { %1751 = vrsqrt.f32 %v2495_v28  ;;  %v1183_v55 = vmul.f32 0.0012755102, %v1167_v32  ;;  %vm1235_vm6 = vweird.f32 %v2495_v28 }
 0x213   : > { %v1212_v19 = vmul.f32 0.5, %v1211_v54  ;;  %v2501_v44 = vadd.f32 1e-05, %v1194_v43  ;;  %v1158_v33 = vpop.xlane.xlu1 %1157  ;;  %v1289_v43 = vld [vmem:[%s2733_s2] sm:$0xff] }
 0x214   : > { %v1182_v35 = vmul.f32 0.0012755102, %v1158_v33  ;;  %v1199_v23 = vsub.f32 %v1183_v55, %v1191_v37 }
 0x215   : > { %v1213_v49 = vsub.f32 1.5, %v1212_v19  ;;  %1753 = vrsqrt.f32 %v2501_v44  ;;  %vm1225_vm9 = vweird.f32 %v2501_v44 }
 0x216   : > { %v2508_v63 = vpop.eup %1749  ;;  %v1198_v8 = vsub.f32 %v1182_v35, %v1190_v16  ;;  %v1149_v46 = vpop.xlane.xlu0 %1148  ;;  %v2510_v10 = vadd.f32 1e-05, %v1199_v23 }
 0x217   : > { %v1181_v6 = vmul.f32 0.0012755102, %v1149_v46  ;;  %v1214_v5 = vmul.f32 %v1748_v7, %v1213_v49  ;;  %v1240_v29 = vmul.f32 %v2508_v63, %v2487_v53  ;;  %vm1246_vm11 = vweird.f32 %v2508_v63  ;;  %v1293_v53 = vld [vmem:[%s2733_s2 + $0x20] sm:$0xff] }
 0x218   : > { %v1752_v15 = vpop.eup %1751  ;;  %v2516_v54 = vadd.f32 1e-05, %v1198_v8  ;;  %1755 = vrsqrt.f32 %v2510_v10  ;;  %vm1247_vm13 = vmor %vm1245_vm12, %vm1246_vm11 }
 0x219   : > { %v1230_v32 = vmul.f32 %v1752_v15, %v2495_v28  ;;  %v1197_v19 = vsub.f32 %v1181_v6, %v1189_v57  ;;  %v1218_v37 = vsel %vm1217_vm4, %v1748_v7, %v1214_v5  ;;  %v1241_v35 = vmul.f32 %v2508_v63, %v1240_v29 }
 0x21a   : > { %1757 = vrsqrt.f32 %v2516_v54  ;;  %v2526_v16 = vmul.f32 %v1289_v43, %v1218_v37  ;;  %vm1236_vm5 = vweird.f32 %v1752_v15  ;;  %vm1265_vm4 = vweird.f32 %v2516_v54 }
 0x21b   : > { %v1754_v33 = vpop.eup %1753  ;;  %v1231_v55 = vmul.f32 %v1752_v15, %v1230_v32  ;;  %v2530_v23 = vadd.f32 1e-05, %v1197_v19  ;;  %v1242_v43 = vmul.f32 0.5, %v1241_v35  ;;  %vm1237_vm7 = vmor %vm1235_vm6, %vm1236_vm5  ;;  %vm1275_vm6 = vweird.f32 %v2510_v10 }
 0x21c   : > { %v1220_v49 = vmul.f32 %v1754_v33, %v2501_v44  ;;  %1331 = vperm.xlu1 %1744, %v2526_v16   ;;  %vm1226_vm8 = vweird.f32 %v1754_v33 }
 0x21d   : > { %v1232_v8 = vmul.f32 0.5, %v1231_v55  ;;  %1759 = vrsqrt.f32 %v2530_v23  ;;  %v1243_v4 = vsub.f32 1.5, %v1242_v43  ;;  %vm1227_vm10 = vmor %vm1225_vm9, %vm1226_vm8  ;;  %vm1255_vm15 = vweird.f32 %v2530_v23 }
 0x21e   : > { %v1221_v46 = vmul.f32 %v1754_v33, %v1220_v49  ;;  %v1176_v6 = vpop.xlane.xlu0 %1175  ;;  %v2534_v7 = vpop.eup %1755 }
 0x21f   : > { %v1233_v5 = vsub.f32 1.5, %v1232_v8  ;;  %v1184_v57 = vmul.f32 0.0012755102, %v1176_v6  ;;  %v1270_v37 = vmul.f32 %v2534_v7, %v2510_v10  ;;  %v1291_v8 = vld [vmem:[%s2733_s2 + $0x10] sm:$0xff]  ;;  %vm1276_vm3 = vweird.f32 %v2534_v7 }
 0x220   : > { %v2538_v29 = vpop.eup %1757  ;;  %v1222_v32 = vmul.f32 0.5, %v1221_v46  ;;  %vm1277_vm9 = vmor %vm1275_vm6, %vm1276_vm3  ;;  %v1295_v10 = vld [vmem:[%s2733_s2 + $0x30] sm:$0xff] }
 0x221   : > { %v1260_v19 = vmul.f32 %v2538_v29, %v2516_v54  ;;  %v1200_v55 = vsub.f32 %v1184_v57, %v1192_v39  ;;  %v1234_v49 = vmul.f32 %v1752_v15, %v1233_v5  ;;  %v1290_v5 = vld [vmem:[%s2733_s2 + $0x8] sm:$0xff]  ;;  %v1271_v57 = vmul.f32 %v2534_v7, %v1270_v37  ;;  %v1296_v54 = vld [vmem:[%s2733_s2 + $0x38] sm:$0xff] }
 0x222   : > { %v1223_v6 = vsub.f32 1.5, %v1222_v32  ;;  %v1306_v37 = vld [vmem:[%s2734_s3 + $0x8] sm:$0xff]  ;;  %vm1266_vm2 = vweird.f32 %v2538_v29 }
 0x223   : > { %v2549_v28 = vadd.f32 1e-05, %v1200_v55  ;;  %v1238_v35 = vsel %vm1237_vm7, %v1752_v15, %v1234_v49  ;;  %v1760_v46 = vpop.eup %1759  ;;  %v1261_v31 = vmul.f32 %v2538_v29, %v1260_v19  ;;  %v1244_v55 = vmul.f32 %v2508_v63, %v1243_v4  ;;  %vm1267_vm7 = vmor %vm1265_vm4, %vm1266_vm2 }
 0x224   : > { %v2552_v48 = vmul.f32 %v1291_v8, %v1238_v35  ;;  %v1224_v39 = vmul.f32 %v1754_v33, %v1223_v6  ;;  %v1250_v32 = vmul.f32 %v1760_v46, %v2530_v23  ;;  %v1272_v49 = vmul.f32 0.5, %v1271_v57  ;;  %v1309_v23 = vld [vmem:[%s2734_s3 + $0x20] sm:$0xff] }
 0x225   : > { %1761 = vrsqrt.f32 %v2549_v28  ;;  %v1262_v19 = vmul.f32 0.5, %v1261_v31  ;;  %vm1256_vm14 = vweird.f32 %v1760_v46  ;;  %vm1285_vm8 = vweird.f32 %v2549_v28 }
 0x226   : > { %1341 = vperm.xlu0 %1746, %v2552_v48   ;;  %v1228_v44 = vsel %vm1227_vm10, %v1754_v33, %v1224_v39  ;;  %v1251_v15 = vmul.f32 %v1760_v46, %v1250_v32  ;;  %v1248_v39 = vsel %vm1247_vm13, %v2508_v63, %v1244_v55  ;;  %v1273_v32 = vsub.f32 1.5, %v1272_v49  ;;  %vm1257_vm0 = vmor %vm1255_vm15, %vm1256_vm14 }
 0x227   : > { %v1298_v43 = vmul.f32 %v1290_v5, %v1228_v44  ;;  %v1263_v31 = vsub.f32 1.5, %v1262_v19  ;;  %v1292_v5 = vld [vmem:[%s2733_s2 + $0x18] sm:$0xff] }
 0x228   : > { %v1252_v8 = vmul.f32 0.5, %v1251_v15  ;;  %v1300_v15 = vmul.f32 %v1292_v5, %v1248_v39  ;;  %v1274_v49 = vmul.f32 %v2534_v7, %v1273_v32  ;;  %v1312_v5 = vld [vmem:[%s2734_s3 + $0x38] sm:$0xff] }
 0x229   : > { %1336 = vperm.xlu2 %1745, %v1298_v43   ;;  %v1314_v6 = vmul.f32 %v1298_v43, %v2483_v34  ;;  %v1264_v55 = vmul.f32 %v2538_v29, %v1263_v31 }
 0x22a   : > { %v1253_v33 = vsub.f32 1.5, %v1252_v8 }
 0x22b   : > { %v1762_v35 = vpop.eup %1761  ;;  %v1322_v57 = vsub.f32 %v1306_v37, %v1314_v6  ;;  %v1268_v37 = vsel %vm1267_vm7, %v2538_v29, %v1264_v55  ;;  %v1294_v6 = vld [vmem:[%s2733_s2 + $0x28] sm:$0xff] }
 0x22c   : > { %v1280_v4 = vmul.f32 %v1762_v35, %v2549_v28  ;;  %v1254_v34 = vmul.f32 %v1760_v46, %v1253_v33  ;;  %vm1286_vm5 = vweird.f32 %v1762_v35  ;;  %v1302_v28 = vmul.f32 %v1294_v6, %v1268_v37 }
 0x22d   : > { %vm1287_vm10 = vmor %vm1285_vm8, %vm1286_vm5 }
 0x22e   : > { %v1281_v44 = vmul.f32 %v1762_v35, %v1280_v4  ;;  %1432 = vperm.xlu0 %1746, %v1322_v57   ;;  %v1258_v43 = vsel %vm1257_vm0, %v1760_v46, %v1254_v34  ;;  %v1305_v34 = vld [vmem:[%s2734_s3] sm:$0xff] }
 0x22f   : > { %v1301_v63 = vmul.f32 %v1293_v53, %v1258_v43  ;;  %v1315_v53 = vmul.f32 %v2552_v48, %v2479_v61  ;;  %v1310_v48 = vld [vmem:[%s2734_s3 + $0x28] sm:$0xff] }
 0x230   : > { %v1282_v19 = vmul.f32 0.5, %v1281_v44  ;;  %v1316_v44 = vmul.f32 %v1300_v15, %v2477_v0  ;;  %v1311_v0 = vld [vmem:[%s2734_s3 + $0x30] sm:$0xff] }
 0x231   : > { %1346 = vperm.xlu2 %1745, %v1300_v15   ;;  %1351 = vperm.xlu1 %1744, %v1301_v63   ;;  %v1317_v46 = vmul.f32 %v1301_v63, %v2503_v1  ;;  %v1278_v1 = vsel %vm1277_vm9, %v2534_v7, %v1274_v49  ;;  %v1313_v7 = vmul.f32 %v2526_v16, %v2473_v45  ;;  %v1308_v45 = vld [vmem:[%s2734_s3 + $0x18] sm:$0xff] }
 0x232   : > { %v1283_v8 = vsub.f32 1.5, %v1282_v19  ;;  %v1303_v39 = vmul.f32 %v1295_v10, %v1278_v1  ;;  %v1324_v43 = vsub.f32 %v1308_v45, %v1316_v44  ;;  %v1318_v19 = vmul.f32 %v1302_v28, %v2493_v42 }
 0x233   : > { %v1325_v33 = vsub.f32 %v1309_v23, %v1317_v46 }
 0x234   : > { %v1284_v31 = vmul.f32 %v1762_v35, %v1283_v8  ;;  %v1319_v63 = vmul.f32 %v1303_v39, %v2491_v24  ;;  %v1326_v61 = vsub.f32 %v1310_v48, %v1318_v19 }
 0x236   : > { %1447 = vperm.xlu0 %1746, %v1325_v33   ;;  %v1288_v29 = vsel %vm1287_vm10, %v1762_v35, %v1284_v31  ;;  %v1321_v35 = vsub.f32 %v1305_v34, %v1313_v7  ;;  %v1327_v15 = vsub.f32 %v1311_v0, %v1319_v63 }
 0x237   : > { %v1304_v4 = vmul.f32 %v1296_v54, %v1288_v29  ;;  %v2758_v29 = vld [vmem:[#allocation6_spill] sm:$0xff] }
 0x239   : > { %1356 = vperm.xlu2 %1745, %v1302_v28   ;;  %v1320_v57 = vmul.f32 %v1304_v4, %v2524_v51  ;;  %1361 = vperm.xlu1 %1744, %v1303_v39   ;;  %v1307_v51 = vld [vmem:[%s2734_s3 + $0x10] sm:$0xff] }
 0x23a   : > { %v1323_v16 = vsub.f32 %v1307_v51, %v1315_v53  ;;  %v2762_v53 = vld [vmem:[#allocation11_spill] sm:$0xff] }
 0x23b   : > { %v1328_v32 = vsub.f32 %v1312_v5, %v1320_v57  ;;  %v2760_v5 = vld [vmem:[#allocation8_spill] sm:$0xff] }
 0x23e   : > { %1462 = vperm.xlu0 %1746, %v1328_v32   ;;  %v2761_v32 = vld [vmem:[#allocation10_spill] sm:$0xff] }
 0x241   : > { %1366 = vperm.xlu2 %1745, %v1304_v4   ;;  %1427 = vperm.xlu1 %1744, %v1321_v35   ;;  %v2759_v4 = vld [vmem:[#allocation7_spill] sm:$0xff] }
 0x249   : > { %1437 = vperm.xlu2 %1745, %v1323_v16   ;;  %1442 = vperm.xlu1 %1744, %v1324_v43  }
 0x251   : > { %1452 = vperm.xlu2 %1745, %v1326_v61   ;;  %1457 = vperm.xlu1 %1744, %v1327_v15  }
 0x283   : > { %v1337_v55 = vpop.permute.xlu2 %1336 }
 0x284   : > { %v1376_v46 = vmul.f32 %v1337_v55, %v2281_v38  ;;  %v1377_v37 = vmul.f32 %v1337_v55, %v2290_v58  ;;  %v1378_v6 = vmul.f32 %v1337_v55, %v2292_v59  ;;  %v1379_v43 = vmul.f32 %v1337_v55, %v2298_v3 }
 0x285   : > { %v1380_v63 = vmul.f32 %v1337_v55, %v2317_v26  ;;  %v1381_v0 = vmul.f32 %v1337_v55, %v2344_v11  ;;  %v1382_v15 = vmul.f32 %v1337_v55, %v2319_v25 }
 0x28b   : > { %v2625_v49 = vpop.permute.xlu2 %1346 }
 0x28e   : > { %v2629_v24 = vpop.permute.xlu1 %1331 }
 0x293   : > { %v1357_v23 = vpop.permute.xlu2 %1356 }
 0x294   : > { %v1405_v26 = vmul.f32 %v1357_v23, %v2238_v56  ;;  %v1407_v25 = vmul.f32 %v1357_v23, %v2260_v22  ;;  %v1410_v56 = vmul.f32 %v1357_v23, %v2277_v36  ;;  %v1763_v22 = vld [vmem:[#allocation3 + $0xe8] sm:$0xff] }
 0x298   : > { %v1342_v8 = vpop.permute.xlu0 %1341 }
 0x299   : > { %v1383_v10 = vmul.f32 %v1342_v8, %v2199_v47  ;;  %v1384_v28 = vmul.f32 %v1342_v8, %v2758_v29  ;;  %v1385_v39 = vmul.f32 %v1342_v8, %v2759_v4  ;;  %v1386_v57 = vmul.f32 %v1342_v8, %v2760_v5  ;;  %v2763_v47 = vld [vmem:[#allocation9_spill] sm:$0xff]  ;;  %v1764_v5 = vld [vmem:[#allocation3 + $0xf0] sm:$0xff] }
 0x29a   : > { %v1387_v38 = vmul.f32 %v1342_v8, %v2761_v32  ;;  %v1388_v44 = vmul.f32 %v1342_v8, %v2762_v53  ;;  %v1389_v45 = vmul.f32 %v1342_v8, %v2763_v47  ;;  %v1766_v32 = vld [vmem:[#allocation3 + $0x100] sm:$0xff]  ;;  %v1768_v53 = vld [vmem:[#allocation3 + $0x110] sm:$0xff] }
 0x29b   : > { %v2627_v42 = vpop.permute.xlu2 %1366 }
 0x2a0   : > { %v1433_v33 = vpop.permute.xlu0 %1432 }
 0x2a1   : > { %v1472_v31 = vadd.f32 %v1433_v33, %v1376_v46  ;;  %v1473_v54 = vadd.f32 %v1433_v33, %v1377_v37  ;;  %v1474_v1 = vadd.f32 %v1433_v33, %v1378_v6  ;;  %v1475_v61 = vadd.f32 %v1433_v33, %v1379_v43 }
 0x2a2   : > { %v1476_v46 = vadd.f32 %v1433_v33, %v1380_v63  ;;  %v1477_v8 = vadd.f32 %v1433_v33, %v1381_v0  ;;  %v1404_v37 = vmul.f32 %v1357_v23, %v2236_v12  ;;  %v1478_v3 = vadd.f32 %v1433_v33, %v1382_v15  ;;  %v1771_v0 = vld [vmem:[#allocation3 + $0x10] sm:$0xff] }
 0x2a3   : > { %v1438_v7 = vpop.permute.xlu2 %1437  ;;  %1528 = vst [vmem:[#allocation3 + $0x38] sm:$0xff] %v1472_v31  ;;  %v2639_v34 = vpop.permute.xlu1 %1351  ;;  %v1406_v31 = vmul.f32 %v1357_v23, %v2240_v13  ;;  %v1409_v33 = vmul.f32 %v1357_v23, %v2286_v50 }
 0x2a4   : > { %v1479_v58 = vadd.f32 %v1438_v7, %v1383_v10  ;;  %v1480_v59 = vadd.f32 %v1438_v7, %v1384_v28  ;;  %v1481_v35 = vadd.f32 %v1438_v7, %v1385_v39  ;;  %1529 = vst [vmem:[#allocation3 + $0x40] sm:$0xff] %v1473_v54  ;;  %v1482_v51 = vadd.f32 %v1438_v7, %v1386_v57 }
 0x2a5   : > { %1530 = vst [vmem:[#allocation3 + $0x48] sm:$0xff] %v1474_v1  ;;  %v1483_v16 = vadd.f32 %v1438_v7, %v1387_v38  ;;  %v1484_v19 = vadd.f32 %v1438_v7, %v1388_v44  ;;  %v1485_v48 = vadd.f32 %v1438_v7, %v1389_v45  ;;  %v1408_v1 = vmul.f32 %v1357_v23, %v2269_v30  ;;  %v1765_v7 = vld [vmem:[#allocation3 + $0xf8] sm:$0xff]  ;;  %v1769_v45 = vld [vmem:[#allocation3] sm:$0xff] }
 0x2a6   : > { %1535 = vst [vmem:[#allocation3 + $0x70] sm:$0xff] %v1479_v58  ;;  %v1397_v28 = vmul.f32 %v2639_v34, %v2187_v41  ;;  %v1398_v39 = vmul.f32 %v1763_v22, %v2639_v34  ;;  %v1399_v57 = vmul.f32 %v1764_v5, %v2639_v34  ;;  %v1400_v36 = vmul.f32 %v1765_v7, %v2639_v34  ;;  %v1767_v58 = vld [vmem:[#allocation3 + $0x108] sm:$0xff]  ;;  %v1775_v7 = vld [vmem:[#allocation3 + $0xb0] sm:$0xff] }
 0x2a7   : > { %1536 = vst [vmem:[#allocation3 + $0x78] sm:$0xff] %v1480_v59  ;;  %v1401_v41 = vmul.f32 %v1766_v32, %v2639_v34  ;;  %v1402_v59 = vmul.f32 %v1767_v58, %v2639_v34  ;;  %v1403_v44 = vmul.f32 %v1768_v53, %v2639_v34 }
 0x2a8   : > { %1537 = vst [vmem:[#allocation3 + $0x80] sm:$0xff] %v1481_v35  ;;  %v1448_v13 = vpop.permute.xlu0 %1447 }
 0x2a9   : > { %1538 = vst [vmem:[#allocation3 + $0x88] sm:$0xff] %v1482_v51  ;;  %v1493_v50 = vadd.f32 %v1448_v13, %v1397_v28  ;;  %v1494_v23 = vadd.f32 %v1448_v13, %v1398_v39  ;;  %v1495_v38 = vadd.f32 %v1448_v13, %v1399_v57  ;;  %v1496_v35 = vadd.f32 %v1448_v13, %v1400_v36  ;;  %v1774_v57 = vld [vmem:[#allocation3 + $0xa8] sm:$0xff] }
 0x2aa   : > { %1539 = vst [vmem:[#allocation3 + $0x90] sm:$0xff] %v1483_v16  ;;  %v1497_v51 = vadd.f32 %v1448_v13, %v1401_v41  ;;  %v1369_v16 = vmul.f32 %v1769_v45, %v2629_v24  ;;  %v1498_v43 = vadd.f32 %v1448_v13, %v1402_v59  ;;  %v1777_v41 = vld [vmem:[#allocation3 + $0xc0] sm:$0xff] }
 0x2ab   : > { %1540 = vst [vmem:[#allocation3 + $0x98] sm:$0xff] %v1484_v19  ;;  %v1453_v6 = vpop.permute.xlu2 %1452  ;;  %v2651_v54 = vpop.permute.xlu1 %1361  ;;  %v1770_v19 = vld [vmem:[#allocation3 + $0x8] sm:$0xff] }
 0x2ac   : > { %1541 = vst.msk [vmem:[#allocation3 + $0xa0] sm:$0xff] %vm858_vm1, %v1485_v48  ;;  %v1500_v11 = vadd.f32 %v1453_v6, %v1404_v37  ;;  %v1501_v55 = vadd.f32 %v1453_v6, %v1405_v26  ;;  %v1502_v12 = vadd.f32 %v1453_v6, %v1406_v31  ;;  %v1503_v10 = vadd.f32 %v1453_v6, %v1407_v25  ;;  %v2764_v37 = vld [vmem:[#allocation12_spill] sm:$0xff]  ;;  %v2765_v26 = vld [vmem:[#allocation13_spill] sm:$0xff] }
 0x2ad   : > { %1531 = vst [vmem:[#allocation3 + $0x50] sm:$0xff] %v1475_v61  ;;  %v1504_v29 = vadd.f32 %v1453_v6, %v1408_v1  ;;  %v1505_v4 = vadd.f32 %v1453_v6, %v1409_v33  ;;  %v1506_v30 = vadd.f32 %v1453_v6, %v1410_v56  ;;  %v1370_v63 = vmul.f32 %v1770_v19, %v2629_v24  ;;  %v1773_v25 = vld [vmem:[#allocation3 + $0x30] sm:$0xff] }
 0x2ae   : > { %1532 = vst [vmem:[#allocation3 + $0x58] sm:$0xff] %v1476_v46  ;;  %v1499_v48 = vadd.f32 %v1448_v13, %v1403_v44  ;;  %v1371_v61 = vmul.f32 %v1771_v0, %v2629_v24  ;;  %v1772_v46 = vld [vmem:[#allocation3 + $0x18] sm:$0xff]  ;;  %v1373_v6 = vmul.f32 %v2629_v24, %v2764_v37  ;;  %v1374_v31 = vmul.f32 %v2629_v24, %v2765_v26 }
 0x2af   : > { %1533 = vst [vmem:[#allocation3 + $0x60] sm:$0xff] %v1477_v8  ;;  %v1372_v34 = vmul.f32 %v1772_v46, %v2629_v24  ;;  %v1420_v13 = vmul.f32 %v2627_v42, %v2313_v20  ;;  %v1424_v20 = vmul.f32 %v2627_v42, %v2354_v2  ;;  %v1393_v2 = vmul.f32 %v1777_v41, %v2625_v49  ;;  %v1779_v44 = vld [vmem:[#allocation3 + $0xd8] sm:$0xff]  ;;  %v2767_v46 = vld [vmem:[#allocation16_spill] sm:$0xff] }
 0x2b0   : > { %1534 = vst.msk [vmem:[#allocation3 + $0x68] sm:$0xff] %vm858_vm1, %v1478_v3 }
 0x2b1   : > { %1556 = vst [vmem:[#allocation3 + $0x118] sm:$0xff] %v1500_v11 }
 0x2b2   : > { %1557 = vst [vmem:[#allocation3 + $0x120] sm:$0xff] %v1501_v55  ;;  %v1375_v55 = vmul.f32 %v1773_v25, %v2629_v24  ;;  %v1421_v24 = vmul.f32 %v2627_v42, %v2328_v52  ;;  %v1390_v52 = vmul.f32 %v1774_v57, %v2625_v49 }
 0x2b3   : > { %1558 = vst [vmem:[#allocation3 + $0x128] sm:$0xff] %v1502_v12  ;;  %v1428_v47 = vpop.permute.xlu1 %1427  ;;  %v1463_v12 = vpop.permute.xlu0 %1462 }
 0x2b4   : > { %1559 = vst [vmem:[#allocation3 + $0x130] sm:$0xff] %v1503_v10  ;;  %v1465_v15 = vadd.f32 %v1428_v47, %v1369_v16  ;;  %v1466_v8 = vadd.f32 %v1428_v47, %v1370_v63  ;;  %v1467_v3 = vadd.f32 %v1428_v47, %v1371_v61  ;;  %v1468_v11 = vadd.f32 %v1428_v47, %v1372_v34  ;;  %v2766_v61 = vld [vmem:[#allocation14_spill] sm:$0xff] }
 0x2b5   : > { %1560 = vst [vmem:[#allocation3 + $0x138] sm:$0xff] %v1504_v29  ;;  %v1469_v1 = vadd.f32 %v1428_v47, %v1373_v6  ;;  %v1470_v33 = vadd.f32 %v1428_v47, %v1374_v31  ;;  %v1418_v10 = vmul.f32 %v2627_v42, %v2309_v17  ;;  %v1471_v56 = vadd.f32 %v1428_v47, %v1375_v55 }
 0x2b6   : > { %1561 = vst [vmem:[#allocation3 + $0x140] sm:$0xff] %v1505_v4  ;;  %v1419_v29 = vmul.f32 %v2627_v42, %v2311_v18  ;;  %v1422_v17 = vmul.f32 %v2627_v42, %v2346_v14  ;;  %v1516_v39 = vadd.f32 %v1463_v12, %v1420_v13  ;;  %v1423_v18 = vmul.f32 %v2627_v42, %v2359_v60 }
 0x2b7   : > { %1562 = vst.msk [vmem:[#allocation3 + $0x148] sm:$0xff] %vm858_vm1, %v1506_v30  ;;  %v1514_v28 = vadd.f32 %v1463_v12, %v1418_v10  ;;  %v1517_v30 = vadd.f32 %v1463_v12, %v1421_v24  ;;  %v1391_v14 = vmul.f32 %v1775_v7, %v2625_v49  ;;  %v1520_v36 = vadd.f32 %v1463_v12, %v1424_v20 }
 0x2b8   : > { %1549 = vst [vmem:[#allocation3 + $0xe0] sm:$0xff] %v1493_v50  ;;  %v1515_v4 = vadd.f32 %v1463_v12, %v1419_v29  ;;  %v1518_v5 = vadd.f32 %v1463_v12, %v1422_v17  ;;  %v1519_v50 = vadd.f32 %v1463_v12, %v1423_v18  ;;  %v1412_v63 = vmul.f32 %v2651_v54, %v2333_v27 }
 0x2b9   : > { %1550 = vst [vmem:[#allocation3 + $0xe8] sm:$0xff] %v1494_v23  ;;  %v1776_v23 = vld [vmem:[#allocation3 + $0xb8] sm:$0xff]  ;;  %v1416_v27 = vmul.f32 %v2651_v54, %v2767_v46 }
 0x2ba   : > { %1551 = vst [vmem:[#allocation3 + $0xf0] sm:$0xff] %v1495_v38  ;;  %v1392_v32 = vmul.f32 %v1776_v23, %v2625_v49  ;;  %v1778_v38 = vld [vmem:[#allocation3 + $0xc8] sm:$0xff] }
 0x2bb   : > { %1552 = vst [vmem:[#allocation3 + $0xf8] sm:$0xff] %v1496_v35  ;;  %v1443_v22 = vpop.permute.xlu1 %1442  ;;  %v1394_v58 = vmul.f32 %v1778_v38, %v2625_v49  ;;  %v1395_v35 = vmul.f32 %v2625_v49, %v2315_v21  ;;  %v1413_v21 = vmul.f32 %v2651_v54, %v2339_v9 }
 0x2bc   : > { %1553 = vst [vmem:[#allocation3 + $0x100] sm:$0xff] %v1497_v51  ;;  %v1486_v60 = vadd.f32 %v1443_v22, %v1390_v52  ;;  %v1487_v42 = vadd.f32 %v1443_v22, %v1391_v14  ;;  %v1488_v59 = vadd.f32 %v1443_v22, %v1392_v32  ;;  %v1489_v53 = vadd.f32 %v1443_v22, %v1393_v2 }
 0x2bd   : > { %1554 = vst [vmem:[#allocation3 + $0x108] sm:$0xff] %v1498_v43  ;;  %v1396_v51 = vmul.f32 %v1779_v44, %v2625_v49  ;;  %v1490_v47 = vadd.f32 %v1443_v22, %v1394_v58  ;;  %v1491_v16 = vadd.f32 %v1443_v22, %v1395_v35  ;;  %v1411_v43 = vmul.f32 %v2651_v54, %v2331_v62 }
 0x2be   : > { %1555 = vst.msk [vmem:[#allocation3 + $0x110] sm:$0xff] %vm858_vm1, %v1499_v48  ;;  %v1414_v49 = vmul.f32 %v2651_v54, %v2357_v40 }
 0x2bf   : > { %1521 = vst [vmem:[#allocation3] sm:$0xff] %v1465_v15  ;;  %v1492_v19 = vadd.f32 %v1443_v22, %v1396_v51  ;;  %v1415_v15 = vmul.f32 %v2651_v54, %v2766_v61 }
 0x2c0   : > { %1522 = vst [vmem:[#allocation3 + $0x8] sm:$0xff] %v1466_v8  ;;  %v2768_v8 = vld [vmem:[#allocation15_spill] sm:$0xff] }
 0x2c1   : > { %1523 = vst [vmem:[#allocation3 + $0x10] sm:$0xff] %v1467_v3  ;;  %v1417_v9 = vmul.f32 %v2651_v54, %v2768_v8 }
 0x2c2   : > { %1524 = vst [vmem:[#allocation3 + $0x18] sm:$0xff] %v1468_v11 }
 0x2c3   : > { %1525 = vst [vmem:[#allocation3 + $0x20] sm:$0xff] %v1469_v1  ;;  %v1458_v45 = vpop.permute.xlu1 %1457 }
 0x2c4   : > { %1526 = vst [vmem:[#allocation3 + $0x28] sm:$0xff] %v1470_v33  ;;  %v1507_v48 = vadd.f32 %v1458_v45, %v1411_v43  ;;  %v1508_v0 = vadd.f32 %v1458_v45, %v1412_v63  ;;  %v1509_v62 = vadd.f32 %v1458_v45, %v1413_v21  ;;  %v1510_v34 = vadd.f32 %v1458_v45, %v1414_v49 }
 0x2c5   : > { %1527 = vst.msk [vmem:[#allocation3 + $0x30] sm:$0xff] %vm858_vm1, %v1471_v56  ;;  %v1511_v37 = vadd.f32 %v1458_v45, %v1415_v15  ;;  %v1512_v6 = vadd.f32 %v1458_v45, %v1416_v27  ;;  %v1513_v40 = vadd.f32 %v1458_v45, %v1417_v9 }
 0x2c6   : > { %1570 = vst [vmem:[#allocation3 + $0x188] sm:$0xff] %v1514_v28 }
 0x2c7   : > { %1571 = vst [vmem:[#allocation3 + $0x190] sm:$0xff] %v1515_v4 }
 0x2c8   : > { %1572 = vst [vmem:[#allocation3 + $0x198] sm:$0xff] %v1516_v39 }
 0x2c9   : > { %1573 = vst [vmem:[#allocation3 + $0x1a0] sm:$0xff] %v1517_v30 }
 0x2ca   : > { %1574 = vst [vmem:[#allocation3 + $0x1a8] sm:$0xff] %v1518_v5 }
 0x2cb   : > { %1575 = vst [vmem:[#allocation3 + $0x1b0] sm:$0xff] %v1519_v50 }
 0x2cc   : > { %1576 = vst.msk [vmem:[#allocation3 + $0x1b8] sm:$0xff] %vm858_vm1, %v1520_v36 }
 0x2cd   : > { %1542 = vst [vmem:[#allocation3 + $0xa8] sm:$0xff] %v1486_v60 }
 0x2ce   : > { %1543 = vst [vmem:[#allocation3 + $0xb0] sm:$0xff] %v1487_v42 }
 0x2cf   : > { %1544 = vst [vmem:[#allocation3 + $0xb8] sm:$0xff] %v1488_v59 }
 0x2d0   : > { %1545 = vst [vmem:[#allocation3 + $0xc0] sm:$0xff] %v1489_v53 }
 0x2d1   : > { %1546 = vst [vmem:[#allocation3 + $0xc8] sm:$0xff] %v1490_v47 }
 0x2d2   : > { %1547 = vst [vmem:[#allocation3 + $0xd0] sm:$0xff] %v1491_v16 }
 0x2d3   : > { %1548 = vst.msk [vmem:[#allocation3 + $0xd8] sm:$0xff] %vm858_vm1, %v1492_v19 }
 0x2d4   : > { %1563 = vst [vmem:[#allocation3 + $0x150] sm:$0xff] %v1507_v48 }
 0x2d5   : > { %1564 = vst [vmem:[#allocation3 + $0x158] sm:$0xff] %v1508_v0 }
 0x2d6   : > { %1565 = vst [vmem:[#allocation3 + $0x160] sm:$0xff] %v1509_v62 }
 0x2d7   : > { %1566 = vst [vmem:[#allocation3 + $0x168] sm:$0xff] %v1510_v34 }
 0x2d8   : > { %1567 = vst [vmem:[#allocation3 + $0x170] sm:$0xff] %v1511_v37 }
 0x2d9   : > { %1568 = vst [vmem:[#allocation3 + $0x178] sm:$0xff] %v1512_v6 }
 0x2da   : > { %1569 = vst.msk [vmem:[#allocation3 + $0x180] sm:$0xff] %vm858_vm1, %v1513_v40 }
 0x2db PF: > { %p1713_p11 = scmp.eq.s32.totalorder %s1882_s18, 2  ;;  %s1838_s26 = smov [#allocation3]  }
 0x2dc   : > { %s1582_s27 = sshll.u32 %s1838_s26, 4  ;;  %s1584_s30 = sshll.u32 %s2735_s4, 4  ;;  %s1583_s27 = int_to_ptr.vmem [resolvable:$true] %s1582_s27  ;;  %s1585_s30 = int_to_ptr.hbm [resolvable:$true] %s1584_s30 }
 0x2dd   : > { %s1839_s5 = smov 896   ;;  %s1840_s6 = smov 56  }
 0x2de   : > { %1710 = dma.vmem_to_hbm [thread:$0]  (%p1713_p11), %s1583_s27, 7168, %s1585_s30, [#allocation4], %s1839_s5, %s1839_s5, %s1840_s6  }
 0x2df   : > { %1821 = dma.done.wait (%p1713_p11), [#allocation4], 7168  }
 0x2e0   : > { %1823 = vsyncadd (%p1713_p11), [#allocation4], 4294960128 }
 0x2e1 PF: > { %p12_p12 = scmp.ge.s32.totalorder %s1885_s19, 5   ;;  %s2769_s15 = smov %s1830_s16 }
 0x2e2   : > { %s2770_s16 = smov %s1894_s22  ;;  %s2771_s17 = smov %s1885_s19 }
 0x2e3   :  { %14 = sbr.rel (!%p12_p12) target bundleno = 2 (0x2), region = 117 }
 0x2e8   :  { %1601 = vsyncpa [#allocation4], 1 }
 0x2e9   :  { %1603 = vsyncpa [#allocation4 + $0x1], 1 }

</bundles_post_ra>
